<compile_context>
chip_gen: v7x
topology: tpu7x:2x2x1
jax: 0.10.0
libtpu: 0.0.40
codegen_flags: <defaults>
</compile_context>

<pallas_src>
import functools

import jax
import jax.numpy as jnp
import numpy as np
from jax.experimental import pallas as pl
from jax.experimental.pallas import tpu as pltpu

EPS = 1e-5


def crn_kernel(
    # data (time-major: (L, B, C))
    cov_ref, trh_ref, outh_ref, trt_ref,
    # encoder GRU weights (gate-fused: [r|z|n] along the output dim)
    enc_wih_ref, enc_whh_ref, enc_bi_ref, enc_bhn_ref,
    # decoder GRUCell weights (gate-fused)
    dec_wih_ref, dec_whh_ref, dec_bi_ref, dec_bhn_ref,
    # output linear head
    out_w_ref, out_b_ref,
    # outputs (time-major)
    pred_ref, rep_ref,
):
    Lh, B, _ = cov_ref.shape
    Lf = trt_ref.shape[0]
    H = rep_ref.shape[-1]
    Co = out_b_ref.shape[-1]
    H2 = 2 * H
    H3 = 3 * H

    cov = cov_ref[...].astype(jnp.float32)
    trh = trh_ref[...].astype(jnp.float32)
    outh = outh_ref[...].astype(jnp.float32)
    trt = trt_ref[...].astype(jnp.float32)

    # ---- FixedLayerNorm1D(covariate_history): stats over the seq (leading) dim ----
    cov_m = jnp.mean(cov, axis=0, keepdims=True)
    cov_v = jnp.mean((cov - cov_m) ** 2, axis=0, keepdims=True)
    cov_n = (cov - cov_m) * jax.lax.rsqrt(cov_v + EPS)

    # ---- FixedTransferableNorm: stats from treatment_history, applied to both ----
    trh_m = jnp.mean(trh, axis=0, keepdims=True)
    trh_v = jnp.mean((trh - trh_m) ** 2, axis=0, keepdims=True)
    trh_rs = jax.lax.rsqrt(trh_v + EPS)
    trh_n = (trh - trh_m) * trh_rs          # .transfer(treatment_history)
    trt_n = (trt - trh_m) * trh_rs          # forward(treatments, treatment_history)

    # ---- FixedAllBackNorm: stats from outcome_history (also used for inverse) ----
    outh_m = jnp.mean(outh, axis=0, keepdims=True)
    outh_v = jnp.mean((outh - outh_m) ** 2, axis=0, keepdims=True)
    outh_std = jnp.sqrt(outh_v + EPS)
    outh_n = (outh - outh_m) / outh_std     # .transfer(outcome_history)

    # weights (already transposed / gate-fused in the wrapper)
    enc_wih = enc_wih_ref[...]   # (Cin, 3H)
    enc_whh = enc_whh_ref[...]   # (H, 3H)
    enc_bi = enc_bi_ref[...]     # (1, 3H)   b_ih (+ b_hh folded in for r, z)
    dec_wih = dec_wih_ref[...]   # (Ct, 3H)
    dec_whh = dec_whh_ref[...]   # (H, 3H)
    dec_bi = dec_bi_ref[...]     # (1, 3H)
    out_w = out_w_ref[...]       # (H, Co)
    out_b = out_b_ref[...]       # (1, Co)
    # hoist the b_hn broadcasts out of the recurrent loops (no CSE of broadcasts)
    enc_bhn = jnp.broadcast_to(enc_bhn_ref[...], (B, H))
    dec_bhn = jnp.broadcast_to(dec_bhn_ref[...], (B, H))

    # ---- encoder input projection: one lane concat + ONE matmul for all gates ----
    enc_in = jnp.concatenate([cov_n, trh_n, outh_n], axis=-1)   # (Lh, B, Cin)
    cin = enc_in.shape[-1]
    gi_enc = (jnp.dot(enc_in.reshape(Lh * B, cin), enc_wih,
                      preferred_element_type=jnp.float32)
              + enc_bi).reshape(Lh, B, H3)

    # ---- encoder GRU over history (zero initial hidden); static unroll ----
    # one (B, H) @ (H, 3H) dot per step; r/z/n via static lane slices
    h = jnp.zeros((B, H), jnp.float32)
    for t in range(Lh):
        gi = gi_enc[t]                                           # (B, 3H)
        gh = jnp.dot(h, enc_whh, preferred_element_type=jnp.float32)
        r = jax.nn.sigmoid(gi[:, :H] + gh[:, :H])
        z = jax.nn.sigmoid(gi[:, H:H2] + gh[:, H:H2])
        n = jnp.tanh(gi[:, H2:] + r * (gh[:, H2:] + enc_bhn))
        h = (1.0 - z) * n + z * h

    # ---- decoder input projection: ONE matmul over all future steps & gates ----
    ct = trt_n.shape[-1]
    gi_dec = (jnp.dot(trt_n.reshape(Lf * B, ct), dec_wih,
                      preferred_element_type=jnp.float32)
              + dec_bi).reshape(Lf, B, H3)

    # ---- decoder GRUCell; hidden states accumulated in registers, stacked once ----
    hs = []
    for t in range(Lf):
        gi = gi_dec[t]                                           # (B, 3H)
        gh = jnp.dot(h, dec_whh, preferred_element_type=jnp.float32)
        r = jax.nn.sigmoid(gi[:, :H] + gh[:, :H])
        z = jax.nn.sigmoid(gi[:, H:H2] + gh[:, H:H2])
        n = jnp.tanh(gi[:, H2:] + r * (gh[:, H2:] + dec_bhn))
        h = (1.0 - z) * n + z * h
        hs.append(h)

    rep = jnp.stack(hs, axis=0)                                  # (Lf, B, H)
    rep_ref[...] = rep.astype(rep_ref.dtype)                     # one dense store

    # ---- batched head + inverse outcome norm; one dense store ----
    pred = (jnp.dot(rep.reshape(Lf * B, H), out_w,
                    preferred_element_type=jnp.float32) + out_b).reshape(Lf, B, Co)
    pred = pred * outh_std + outh_m                              # norm_outcomes.inverse
    pred_ref[...] = pred.astype(pred_ref.dtype)


def _gru_weights(w_ih, w_hh, b_ih, b_hh, H):
    """PyTorch GRU params -> gate-fused, transposed operands.

    Returns (w_ih_T: (Cin, 3H), w_hh_T: (H, 3H), bi: (1, 3H), bhn: (1, H)) with the
    PyTorch (r, z, n) gate order preserved along the output dim.  b_hh of the r/z
    gates is folded into bi; b_hn stays separate because PyTorch applies it inside
    the reset-gated term of the n gate.
    """
    w_ih_T = jnp.asarray(w_ih).T
    w_hh_T = jnp.asarray(w_hh).T
    b_ih = jnp.asarray(b_ih)
    b_hh = jnp.asarray(b_hh)
    bi = jnp.concatenate([b_ih[:2 * H] + b_hh[:2 * H], b_ih[2 * H:]]).reshape(1, 3 * H)
    bhn = b_hh[2 * H:].reshape(1, H)
    return w_ih_T, w_hh_T, bi, bhn


def crn_forward(cov_hist, treat_hist, outcome_hist, treatments, params):
    B, Lf, Ct = treatments.shape
    Lh = cov_hist.shape[1]
    Cc = cov_hist.shape[-1]
    Co = outcome_hist.shape[-1]
    H = params["enc_w_hh"].shape[0] // 3
    Cin = Cc + Ct + Co

    # The hoisted time-batched projections flatten (L, B, C) -> (L*B, C); keeping L a
    # multiple of 8 keeps those reshapes tile-aligned.
    # TODO(synk): for general L, pad the sequences / mask the history stats.
    assert Lh % 8 == 0 and Lf % 8 == 0, "sequence lengths must be multiples of 8"

    # ---- gate-fused weight prep (glue, not compute) ----
    enc_wih, enc_whh, enc_bi, enc_bhn = _gru_weights(
        params["enc_w_ih"], params["enc_w_hh"], params["enc_b_ih"], params["enc_b_hh"], H)
    dec_wih, dec_whh, dec_bi, dec_bhn = _gru_weights(
        params["dec_w_ih"], params["dec_w_hh"], params["dec_b_ih"], params["dec_b_hh"], H)
    out_w = params["out_w"].T                                    # (H, Co)
    out_b = params["out_b"].reshape(1, Co)

    # time-major layout plumbing (layout, not compute-hoisting)
    cov_tm = jnp.transpose(cov_hist, (1, 0, 2))
    trh_tm = jnp.transpose(treat_hist, (1, 0, 2))
    outh_tm = jnp.transpose(outcome_hist, (1, 0, 2))
    trt_tm = jnp.transpose(treatments, (1, 0, 2))

    inputs = (cov_tm, trh_tm, outh_tm, trt_tm,
              enc_wih, enc_whh, enc_bi, enc_bhn,
              dec_wih, dec_whh, dec_bi, dec_bhn, out_w, out_b)

    # advisory cost estimate for the XLA scheduler
    flops = (2 * B * Lh * Cin * 3 * H            # encoder input projection
             + 2 * Lh * B * H * 3 * H            # encoder recurrence
             + 2 * B * Lf * Ct * 3 * H           # decoder input projection
             + 2 * Lf * B * H * 3 * H            # decoder recurrence
             + 2 * B * Lf * H * Co)              # head
    transcendentals = (Lh + Lf) * B * 3 * H
    bytes_accessed = 4 * (sum(int(np.prod(x.shape)) for x in inputs)
                          + B * Lf * (Co + H))

    vmem = pl.BlockSpec(memory_space=pltpu.MemorySpace.VMEM)
    pred_tm, rep_tm = pl.pallas_call(
        crn_kernel,
        out_shape=(
            jax.ShapeDtypeStruct((Lf, B, Co), jnp.float32),
            jax.ShapeDtypeStruct((Lf, B, H), jnp.float32),
        ),
        in_specs=[vmem] * len(inputs),
        out_specs=(vmem, vmem),
        cost_estimate=pl.CostEstimate(
            flops=int(flops),
            transcendentals=int(transcendentals),
            bytes_accessed=int(bytes_accessed)),
    )(*inputs)
    # back to the module's (B, L, C) layout
    return jnp.transpose(pred_tm, (1, 0, 2)), jnp.transpose(rep_tm, (1, 0, 2))


# ---------------- pure-JAX reference (same math, for verification) ----------------
def crn_reference(cov_hist, treat_hist, outcome_hist, treatments, params):
    H = params["enc_w_hh"].shape[0] // 3

    def seq_stats(x):
        m = jnp.mean(x, axis=1, keepdims=True)
        v = jnp.mean((x - m) ** 2, axis=1, keepdims=True)
        return m, v

    cm, cv = seq_stats(cov_hist)
    cov_n = (cov_hist - cm) / jnp.sqrt(cv + EPS)
    tm, tv = seq_stats(treat_hist)
    trh_n = (treat_hist - tm) / jnp.sqrt(tv + EPS)
    trt_n = (treatments - tm) / jnp.sqrt(tv + EPS)
    om, ov = seq_stats(outcome_hist)
    ostd = jnp.sqrt(ov + EPS)
    outh_n = (outcome_hist - om) / ostd

    def gru(x, h, w_ih, w_hh, b_ih, b_hh):
        gi = x @ w_ih.T + b_ih
        gh = h @ w_hh.T + b_hh
        r = jax.nn.sigmoid(gi[:, :H] + gh[:, :H])
        z = jax.nn.sigmoid(gi[:, H:2 * H] + gh[:, H:2 * H])
        n = jnp.tanh(gi[:, 2 * H:] + r * gh[:, 2 * H:])
        return (1 - z) * n + z * h

    enc_in = jnp.concatenate([cov_n, trh_n, outh_n], axis=-1)
    B, Lh, _ = enc_in.shape
    h = jnp.zeros((B, H), jnp.float32)
    for t in range(Lh):
        h = gru(enc_in[:, t], h, params["enc_w_ih"], params["enc_w_hh"],
                params["enc_b_ih"], params["enc_b_hh"])

    reps, preds = [], []
    for t in range(treatments.shape[1]):
        h = gru(trt_n[:, t], h, params["dec_w_ih"], params["dec_w_hh"],
                params["dec_b_ih"], params["dec_b_hh"])
        reps.append(h)
        p = h @ params["out_w"].T + params["out_b"]
        preds.append(p * ostd[:, 0, :] + om[:, 0, :])
    return jnp.stack(preds, axis=1), jnp.stack(reps, axis=1)


def init_params(key, covariate_size, treatment_size, outcome_size, hidden_size):
    """Deterministic PyTorch-style uniform(-1/sqrt(H), 1/sqrt(H)) init."""
    input_size = covariate_size + treatment_size + outcome_size
    H = hidden_size
    k_rnn = 1.0 / np.sqrt(H)
    k_lin = 1.0 / np.sqrt(H)
    keys = jax.random.split(key, 10)

    def u(k, shape, scale):
        return jax.random.uniform(k, shape, jnp.float32, -scale, scale)

    return {
        "enc_w_ih": u(keys[0], (3 * H, input_size), k_rnn),
        "enc_w_hh": u(keys[1], (3 * H, H), k_rnn),
        "enc_b_ih": u(keys[2], (3 * H,), k_rnn),
        "enc_b_hh": u(keys[3], (3 * H,), k_rnn),
        "dec_w_ih": u(keys[4], (3 * H, treatment_size), k_rnn),
        "dec_w_hh": u(keys[5], (3 * H, H), k_rnn),
        "dec_b_ih": u(keys[6], (3 * H,), k_rnn),
        "dec_b_hh": u(keys[7], (3 * H,), k_rnn),
        "out_w": u(keys[8], (outcome_size, H), k_lin),
        "out_b": u(keys[9], (outcome_size,), k_lin),
    }


if __name__ == "__main__":
    # small shapes consistent with the module (sequence lengths multiples of 8)
    B, L_hist, L_fut = 2, 8, 8
    covariate_size, treatment_size, outcome_size, hidden_size = 4, 3, 2, 32

    key = jax.random.PRNGKey(0)
    k_cov, k_trh, k_outh, k_trt, k_out, k_par = jax.random.split(key, 6)

    covariate_history = jax.random.normal(k_cov, (B, L_hist, covariate_size), jnp.float32)
    treatment_history = jax.random.normal(k_trh, (B, L_hist, treatment_size), jnp.float32)
    outcome_history = jax.random.normal(k_outh, (B, L_hist, outcome_size), jnp.float32)
    treatments = jax.random.normal(k_trt, (B, L_fut, treatment_size), jnp.float32)
    outcomes = jax.random.normal(k_out, (B, L_fut, outcome_size), jnp.float32)  # unused by forward outputs

    params = init_params(k_par, covariate_size, treatment_size, outcome_size, hidden_size)

    fwd = jax.jit(functools.partial(crn_forward, params=params))
    pred_outcomes, representations = fwd(covariate_history, treatment_history,
                                         outcome_history, treatments)
    jax.block_until_ready((pred_outcomes, representations))

    ref_pred, ref_rep = crn_reference(covariate_history, treatment_history,
                                      outcome_history, treatments, params)

    assert pred_outcomes.shape == (B, L_fut, outcome_size)
    assert representations.shape == (B, L_fut, hidden_size)
    np.testing.assert_allclose(np.asarray(pred_outcomes), np.asarray(ref_pred),
                               rtol=1e-5, atol=1e-5)
    np.testing.assert_allclose(np.asarray(representations), np.asarray(ref_rep),
                               rtol=1e-5, atol=1e-5)
    print("KERNEL_OK")
</pallas_src>

<mosaic_0001>
module attributes {stable_mosaic.version = 11 : i64} {
  func.func @crn_kernel(%arg0: memref<8x2x4xf32, #tpu.memory_space<vmem>>, %arg1: memref<8x2x3xf32, #tpu.memory_space<vmem>>, %arg2: memref<8x2x2xf32, #tpu.memory_space<vmem>>, %arg3: memref<8x2x3xf32, #tpu.memory_space<vmem>>, %arg4: memref<9x96xf32, #tpu.memory_space<vmem>>, %arg5: memref<32x96xf32, #tpu.memory_space<vmem>>, %arg6: memref<1x96xf32, #tpu.memory_space<vmem>>, %arg7: memref<1x32xf32, #tpu.memory_space<vmem>>, %arg8: memref<3x96xf32, #tpu.memory_space<vmem>>, %arg9: memref<32x96xf32, #tpu.memory_space<vmem>>, %arg10: memref<1x96xf32, #tpu.memory_space<vmem>>, %arg11: memref<1x32xf32, #tpu.memory_space<vmem>>, %arg12: memref<32x2xf32, #tpu.memory_space<vmem>>, %arg13: memref<1x2xf32, #tpu.memory_space<vmem>>, %arg14: memref<8x2x2xf32, #tpu.memory_space<vmem>>, %arg15: memref<8x2x32xf32, #tpu.memory_space<vmem>>) attributes {dimension_semantics = [], scalar_prefetch = 0 : i64, scratch_operands = 0 : i64, tpu.core_type = #tpu.core_type<tc>} {
    %c0 = arith.constant 0 : index
    %c0_0 = arith.constant 0 : index
    %c0_1 = arith.constant 0 : index
    %0 = vector.load %arg0[%c0, %c0_0, %c0_1] : memref<8x2x4xf32, #tpu.memory_space<vmem>>, vector<8x2x4xf32>
    %c0_2 = arith.constant 0 : index
    %c0_3 = arith.constant 0 : index
    %c0_4 = arith.constant 0 : index
    %1 = vector.load %arg1[%c0_2, %c0_3, %c0_4] : memref<8x2x3xf32, #tpu.memory_space<vmem>>, vector<8x2x3xf32>
    %c0_5 = arith.constant 0 : index
    %c0_6 = arith.constant 0 : index
    %c0_7 = arith.constant 0 : index
    %2 = vector.load %arg2[%c0_5, %c0_6, %c0_7] : memref<8x2x2xf32, #tpu.memory_space<vmem>>, vector<8x2x2xf32>
    %c0_8 = arith.constant 0 : index
    %c0_9 = arith.constant 0 : index
    %c0_10 = arith.constant 0 : index
    %3 = vector.load %arg3[%c0_8, %c0_9, %c0_10] : memref<8x2x3xf32, #tpu.memory_space<vmem>>, vector<8x2x3xf32>
    %cst = arith.constant dense<0.000000e+00> : vector<2x4xf32>
    %4 = vector.multi_reduction <add>, %0, %cst [0] : vector<8x2x4xf32> to vector<2x4xf32>
    %5 = vector.shape_cast %4 : vector<2x4xf32> to vector<1x2x4xf32>
    %cst_11 = arith.constant 8.000000e+00 : f32
    %6 = vector.broadcast %cst_11 : f32 to vector<1x2x4xf32>
    %7 = arith.divf %5, %6 : vector<1x2x4xf32>
    %8 = vector.broadcast %7 : vector<1x2x4xf32> to vector<8x2x4xf32>
    %9 = arith.subf %0, %8 : vector<8x2x4xf32>
    %10 = arith.mulf %9, %9 : vector<8x2x4xf32>
    %cst_12 = arith.constant dense<0.000000e+00> : vector<2x4xf32>
    %11 = vector.multi_reduction <add>, %10, %cst_12 [0] : vector<8x2x4xf32> to vector<2x4xf32>
    %12 = vector.shape_cast %11 : vector<2x4xf32> to vector<1x2x4xf32>
    %cst_13 = arith.constant 8.000000e+00 : f32
    %13 = vector.broadcast %cst_13 : f32 to vector<1x2x4xf32>
    %14 = arith.divf %12, %13 : vector<1x2x4xf32>
    %15 = vector.broadcast %7 : vector<1x2x4xf32> to vector<8x2x4xf32>
    %16 = arith.subf %0, %15 : vector<8x2x4xf32>
    %cst_14 = arith.constant 9.99999974E-6 : f32
    %17 = vector.broadcast %cst_14 : f32 to vector<1x2x4xf32>
    %18 = arith.addf %14, %17 : vector<1x2x4xf32>
    %19 = math.rsqrt %18 : vector<1x2x4xf32>
    %20 = vector.broadcast %19 : vector<1x2x4xf32> to vector<8x2x4xf32>
    %21 = arith.mulf %16, %20 : vector<8x2x4xf32>
    %cst_15 = arith.constant dense<0.000000e+00> : vector<2x3xf32>
    %22 = vector.multi_reduction <add>, %1, %cst_15 [0] : vector<8x2x3xf32> to vector<2x3xf32>
    %23 = vector.shape_cast %22 : vector<2x3xf32> to vector<1x2x3xf32>
    %cst_16 = arith.constant 8.000000e+00 : f32
    %24 = vector.broadcast %cst_16 : f32 to vector<1x2x3xf32>
    %25 = arith.divf %23, %24 : vector<1x2x3xf32>
    %26 = vector.broadcast %25 : vector<1x2x3xf32> to vector<8x2x3xf32>
    %27 = arith.subf %1, %26 : vector<8x2x3xf32>
    %28 = arith.mulf %27, %27 : vector<8x2x3xf32>
    %cst_17 = arith.constant dense<0.000000e+00> : vector<2x3xf32>
    %29 = vector.multi_reduction <add>, %28, %cst_17 [0] : vector<8x2x3xf32> to vector<2x3xf32>
    %30 = vector.shape_cast %29 : vector<2x3xf32> to vector<1x2x3xf32>
    %cst_18 = arith.constant 8.000000e+00 : f32
    %31 = vector.broadcast %cst_18 : f32 to vector<1x2x3xf32>
    %32 = arith.divf %30, %31 : vector<1x2x3xf32>
    %cst_19 = arith.constant 9.99999974E-6 : f32
    %33 = vector.broadcast %cst_19 : f32 to vector<1x2x3xf32>
    %34 = arith.addf %32, %33 : vector<1x2x3xf32>
    %35 = math.rsqrt %34 : vector<1x2x3xf32>
    %36 = vector.broadcast %25 : vector<1x2x3xf32> to vector<8x2x3xf32>
    %37 = arith.subf %1, %36 : vector<8x2x3xf32>
    %38 = vector.broadcast %35 : vector<1x2x3xf32> to vector<8x2x3xf32>
    %39 = arith.mulf %37, %38 : vector<8x2x3xf32>
    %40 = vector.broadcast %25 : vector<1x2x3xf32> to vector<8x2x3xf32>
    %41 = arith.subf %3, %40 : vector<8x2x3xf32>
    %42 = vector.broadcast %35 : vector<1x2x3xf32> to vector<8x2x3xf32>
    %43 = arith.mulf %41, %42 : vector<8x2x3xf32>
    %cst_20 = arith.constant dense<0.000000e+00> : vector<2x2xf32>
    %44 = vector.multi_reduction <add>, %2, %cst_20 [0] : vector<8x2x2xf32> to vector<2x2xf32>
    %45 = vector.shape_cast %44 : vector<2x2xf32> to vector<1x2x2xf32>
    %cst_21 = arith.constant 8.000000e+00 : f32
    %46 = vector.broadcast %cst_21 : f32 to vector<1x2x2xf32>
    %47 = arith.divf %45, %46 : vector<1x2x2xf32>
    %48 = vector.broadcast %47 : vector<1x2x2xf32> to vector<8x2x2xf32>
    %49 = arith.subf %2, %48 : vector<8x2x2xf32>
    %50 = arith.mulf %49, %49 : vector<8x2x2xf32>
    %cst_22 = arith.constant dense<0.000000e+00> : vector<2x2xf32>
    %51 = vector.multi_reduction <add>, %50, %cst_22 [0] : vector<8x2x2xf32> to vector<2x2xf32>
    %52 = vector.shape_cast %51 : vector<2x2xf32> to vector<1x2x2xf32>
    %cst_23 = arith.constant 8.000000e+00 : f32
    %53 = vector.broadcast %cst_23 : f32 to vector<1x2x2xf32>
    %54 = arith.divf %52, %53 : vector<1x2x2xf32>
    %cst_24 = arith.constant 9.99999974E-6 : f32
    %55 = vector.broadcast %cst_24 : f32 to vector<1x2x2xf32>
    %56 = arith.addf %54, %55 : vector<1x2x2xf32>
    %57 = math.sqrt %56 : vector<1x2x2xf32>
    %58 = vector.broadcast %47 : vector<1x2x2xf32> to vector<8x2x2xf32>
    %59 = arith.subf %2, %58 : vector<8x2x2xf32>
    %60 = vector.broadcast %57 : vector<1x2x2xf32> to vector<8x2x2xf32>
    %61 = arith.divf %59, %60 : vector<8x2x2xf32>
    %c0_25 = arith.constant 0 : index
    %c0_26 = arith.constant 0 : index
    %62 = vector.load %arg4[%c0_25, %c0_26] : memref<9x96xf32, #tpu.memory_space<vmem>>, vector<9x96xf32>
    %c0_27 = arith.constant 0 : index
    %c0_28 = arith.constant 0 : index
    %63 = vector.load %arg5[%c0_27, %c0_28] : memref<32x96xf32, #tpu.memory_space<vmem>>, vector<32x96xf32>
    %c0_29 = arith.constant 0 : index
    %c0_30 = arith.constant 0 : index
    %64 = vector.load %arg6[%c0_29, %c0_30] : memref<1x96xf32, #tpu.memory_space<vmem>>, vector<1x96xf32>
    %c0_31 = arith.constant 0 : index
    %c0_32 = arith.constant 0 : index
    %65 = vector.load %arg8[%c0_31, %c0_32] : memref<3x96xf32, #tpu.memory_space<vmem>>, vector<3x96xf32>
    %c0_33 = arith.constant 0 : index
    %c0_34 = arith.constant 0 : index
    %66 = vector.load %arg9[%c0_33, %c0_34] : memref<32x96xf32, #tpu.memory_space<vmem>>, vector<32x96xf32>
    %c0_35 = arith.constant 0 : index
    %c0_36 = arith.constant 0 : index
    %67 = vector.load %arg10[%c0_35, %c0_36] : memref<1x96xf32, #tpu.memory_space<vmem>>, vector<1x96xf32>
    %c0_37 = arith.constant 0 : index
    %c0_38 = arith.constant 0 : index
    %68 = vector.load %arg12[%c0_37, %c0_38] : memref<32x2xf32, #tpu.memory_space<vmem>>, vector<32x2xf32>
    %c0_39 = arith.constant 0 : index
    %c0_40 = arith.constant 0 : index
    %69 = vector.load %arg13[%c0_39, %c0_40] : memref<1x2xf32, #tpu.memory_space<vmem>>, vector<1x2xf32>
    %c0_41 = arith.constant 0 : index
    %c0_42 = arith.constant 0 : index
    %70 = vector.load %arg7[%c0_41, %c0_42] : memref<1x32xf32, #tpu.memory_space<vmem>>, vector<1x32xf32>
    %71 = vector.shape_cast %70 : vector<1x32xf32> to vector<1x32xf32>
    %72 = vector.broadcast %71 : vector<1x32xf32> to vector<2x32xf32>
    %c0_43 = arith.constant 0 : index
    %c0_44 = arith.constant 0 : index
    %73 = vector.load %arg11[%c0_43, %c0_44] : memref<1x32xf32, #tpu.memory_space<vmem>>, vector<1x32xf32>
    %74 = vector.shape_cast %73 : vector<1x32xf32> to vector<1x32xf32>
    %75 = vector.broadcast %74 : vector<1x32xf32> to vector<2x32xf32>
    %76 = tpu.concatenate %21, %39, %61 in 2 : vector<8x2x4xf32>, vector<8x2x3xf32>, vector<8x2x2xf32> -> vector<8x2x9xf32>
    %77 = vector.shape_cast %76 : vector<8x2x9xf32> to vector<16x9xf32>
    %cst_45 = arith.constant dense<0.000000e+00> : vector<16x96xf32>
    %78 = tpu.matmul %77, %62, %cst_45 {dimension_numbers = #tpu.dot_dimension_numbers<[1], [0], [0], [1], [0, 0, 1, 1], [], []>} : vector<16x9xf32>, vector<9x96xf32>, vector<16x96xf32> -> vector<16x96xf32>
    %79 = vector.broadcast %64 : vector<1x96xf32> to vector<16x96xf32>
    %80 = arith.addf %78, %79 : vector<16x96xf32>
    %81 = vector.shape_cast %80 : vector<16x96xf32> to vector<8x2x96xf32>
    %cst_46 = arith.constant 0.000000e+00 : f32
    %82 = vector.broadcast %cst_46 : f32 to vector<2x32xf32>
    %83 = vector.extract_strided_slice %81 {offsets = [0, 0, 0], sizes = [1, 2, 96], strides = [1, 1, 1]} : vector<8x2x96xf32> to vector<1x2x96xf32>
    %84 = vector.shape_cast %83 : vector<1x2x96xf32> to vector<2x96xf32>
    %cst_47 = arith.constant dense<0.000000e+00> : vector<2x96xf32>
    %85 = tpu.matmul %82, %63, %cst_47 {dimension_numbers = #tpu.dot_dimension_numbers<[1], [0], [0], [1], [0, 0, 1, 1], [], []>} : vector<2x32xf32>, vector<32x96xf32>, vector<2x96xf32> -> vector<2x96xf32>
    %86 = vector.extract_strided_slice %84 {offsets = [0, 0], sizes = [2, 32], strides = [1, 1]} : vector<2x96xf32> to vector<2x32xf32>
    %87 = vector.extract_strided_slice %85 {offsets = [0, 0], sizes = [2, 32], strides = [1, 1]} : vector<2x96xf32> to vector<2x32xf32>
    %88 = arith.addf %86, %87 : vector<2x32xf32>
    %89 = arith.negf %88 : vector<2x32xf32>
    %90 = math.exp %89 : vector<2x32xf32>
    %cst_48 = arith.constant 1.000000e+00 : f32
    %91 = vector.broadcast %cst_48 : f32 to vector<2x32xf32>
    %92 = arith.addf %91, %90 : vector<2x32xf32>
    %93 = arith.divf %91, %92 : vector<2x32xf32>
    %94 = vector.extract_strided_slice %84 {offsets = [0, 32], sizes = [2, 32], strides = [1, 1]} : vector<2x96xf32> to vector<2x32xf32>
    %95 = vector.extract_strided_slice %85 {offsets = [0, 32], sizes = [2, 32], strides = [1, 1]} : vector<2x96xf32> to vector<2x32xf32>
    %96 = arith.addf %94, %95 : vector<2x32xf32>
    %97 = arith.negf %96 : vector<2x32xf32>
    %98 = math.exp %97 : vector<2x32xf32>
    %cst_49 = arith.constant 1.000000e+00 : f32
    %99 = vector.broadcast %cst_49 : f32 to vector<2x32xf32>
    %100 = arith.addf %99, %98 : vector<2x32xf32>
    %101 = arith.divf %99, %100 : vector<2x32xf32>
    %102 = vector.extract_strided_slice %84 {offsets = [0, 64], sizes = [2, 32], strides = [1, 1]} : vector<2x96xf32> to vector<2x32xf32>
    %103 = vector.extract_strided_slice %85 {offsets = [0, 64], sizes = [2, 32], strides = [1, 1]} : vector<2x96xf32> to vector<2x32xf32>
    %104 = arith.addf %103, %72 : vector<2x32xf32>
    %105 = arith.mulf %93, %104 : vector<2x32xf32>
    %106 = arith.addf %102, %105 : vector<2x32xf32>
    %107 = math.tanh %106 : vector<2x32xf32>
    %cst_50 = arith.constant 1.000000e+00 : f32
    %108 = vector.broadcast %cst_50 : f32 to vector<2x32xf32>
    %109 = arith.subf %108, %101 : vector<2x32xf32>
    %110 = arith.mulf %109, %107 : vector<2x32xf32>
    %111 = arith.mulf %101, %82 : vector<2x32xf32>
    %112 = arith.addf %110, %111 : vector<2x32xf32>
    %113 = vector.extract_strided_slice %81 {offsets = [1, 0, 0], sizes = [1, 2, 96], strides = [1, 1, 1]} : vector<8x2x96xf32> to vector<1x2x96xf32>
    %114 = vector.shape_cast %113 : vector<1x2x96xf32> to vector<2x96xf32>
    %cst_51 = arith.constant dense<0.000000e+00> : vector<2x96xf32>
    %115 = tpu.matmul %112, %63, %cst_51 {dimension_numbers = #tpu.dot_dimension_numbers<[1], [0], [0], [1], [0, 0, 1, 1], [], []>} : vector<2x32xf32>, vector<32x96xf32>, vector<2x96xf32> -> vector<2x96xf32>
    %116 = vector.extract_strided_slice %114 {offsets = [0, 0], sizes = [2, 32], strides = [1, 1]} : vector<2x96xf32> to vector<2x32xf32>
    %117 = vector.extract_strided_slice %115 {offsets = [0, 0], sizes = [2, 32], strides = [1, 1]} : vector<2x96xf32> to vector<2x32xf32>
    %118 = arith.addf %116, %117 : vector<2x32xf32>
    %119 = arith.negf %118 : vector<2x32xf32>
    %120 = math.exp %119 : vector<2x32xf32>
    %cst_52 = arith.constant 1.000000e+00 : f32
    %121 = vector.broadcast %cst_52 : f32 to vector<2x32xf32>
    %122 = arith.addf %121, %120 : vector<2x32xf32>
    %123 = arith.divf %121, %122 : vector<2x32xf32>
    %124 = vector.extract_strided_slice %114 {offsets = [0, 32], sizes = [2, 32], strides = [1, 1]} : vector<2x96xf32> to vector<2x32xf32>
    %125 = vector.extract_strided_slice %115 {offsets = [0, 32], sizes = [2, 32], strides = [1, 1]} : vector<2x96xf32> to vector<2x32xf32>
    %126 = arith.addf %124, %125 : vector<2x32xf32>
    %127 = arith.negf %126 : vector<2x32xf32>
    %128 = math.exp %127 : vector<2x32xf32>
    %cst_53 = arith.constant 1.000000e+00 : f32
    %129 = vector.broadcast %cst_53 : f32 to vector<2x32xf32>
    %130 = arith.addf %129, %128 : vector<2x32xf32>
    %131 = arith.divf %129, %130 : vector<2x32xf32>
    %132 = vector.extract_strided_slice %114 {offsets = [0, 64], sizes = [2, 32], strides = [1, 1]} : vector<2x96xf32> to vector<2x32xf32>
    %133 = vector.extract_strided_slice %115 {offsets = [0, 64], sizes = [2, 32], strides = [1, 1]} : vector<2x96xf32> to vector<2x32xf32>
    %134 = arith.addf %133, %72 : vector<2x32xf32>
    %135 = arith.mulf %123, %134 : vector<2x32xf32>
    %136 = arith.addf %132, %135 : vector<2x32xf32>
    %137 = math.tanh %136 : vector<2x32xf32>
    %cst_54 = arith.constant 1.000000e+00 : f32
    %138 = vector.broadcast %cst_54 : f32 to vector<2x32xf32>
    %139 = arith.subf %138, %131 : vector<2x32xf32>
    %140 = arith.mulf %139, %137 : vector<2x32xf32>
    %141 = arith.mulf %131, %112 : vector<2x32xf32>
    %142 = arith.addf %140, %141 : vector<2x32xf32>
    %143 = vector.extract_strided_slice %81 {offsets = [2, 0, 0], sizes = [1, 2, 96], strides = [1, 1, 1]} : vector<8x2x96xf32> to vector<1x2x96xf32>
    %144 = vector.shape_cast %143 : vector<1x2x96xf32> to vector<2x96xf32>
    %cst_55 = arith.constant dense<0.000000e+00> : vector<2x96xf32>
    %145 = tpu.matmul %142, %63, %cst_55 {dimension_numbers = #tpu.dot_dimension_numbers<[1], [0], [0], [1], [0, 0, 1, 1], [], []>} : vector<2x32xf32>, vector<32x96xf32>, vector<2x96xf32> -> vector<2x96xf32>
    %146 = vector.extract_strided_slice %144 {offsets = [0, 0], sizes = [2, 32], strides = [1, 1]} : vector<2x96xf32> to vector<2x32xf32>
    %147 = vector.extract_strided_slice %145 {offsets = [0, 0], sizes = [2, 32], strides = [1, 1]} : vector<2x96xf32> to vector<2x32xf32>
    %148 = arith.addf %146, %147 : vector<2x32xf32>
    %149 = arith.negf %148 : vector<2x32xf32>
    %150 = math.exp %149 : vector<2x32xf32>
    %cst_56 = arith.constant 1.000000e+00 : f32
    %151 = vector.broadcast %cst_56 : f32 to vector<2x32xf32>
    %152 = arith.addf %151, %150 : vector<2x32xf32>
    %153 = arith.divf %151, %152 : vector<2x32xf32>
    %154 = vector.extract_strided_slice %144 {offsets = [0, 32], sizes = [2, 32], strides = [1, 1]} : vector<2x96xf32> to vector<2x32xf32>
    %155 = vector.extract_strided_slice %145 {offsets = [0, 32], sizes = [2, 32], strides = [1, 1]} : vector<2x96xf32> to vector<2x32xf32>
    %156 = arith.addf %154, %155 : vector<2x32xf32>
    %157 = arith.negf %156 : vector<2x32xf32>
    %158 = math.exp %157 : vector<2x32xf32>
    %cst_57 = arith.constant 1.000000e+00 : f32
    %159 = vector.broadcast %cst_57 : f32 to vector<2x32xf32>
    %160 = arith.addf %159, %158 : vector<2x32xf32>
    %161 = arith.divf %159, %160 : vector<2x32xf32>
    %162 = vector.extract_strided_slice %144 {offsets = [0, 64], sizes = [2, 32], strides = [1, 1]} : vector<2x96xf32> to vector<2x32xf32>
    %163 = vector.extract_strided_slice %145 {offsets = [0, 64], sizes = [2, 32], strides = [1, 1]} : vector<2x96xf32> to vector<2x32xf32>
    %164 = arith.addf %163, %72 : vector<2x32xf32>
    %165 = arith.mulf %153, %164 : vector<2x32xf32>
    %166 = arith.addf %162, %165 : vector<2x32xf32>
    %167 = math.tanh %166 : vector<2x32xf32>
    %cst_58 = arith.constant 1.000000e+00 : f32
    %168 = vector.broadcast %cst_58 : f32 to vector<2x32xf32>
    %169 = arith.subf %168, %161 : vector<2x32xf32>
    %170 = arith.mulf %169, %167 : vector<2x32xf32>
    %171 = arith.mulf %161, %142 : vector<2x32xf32>
    %172 = arith.addf %170, %171 : vector<2x32xf32>
    %173 = vector.extract_strided_slice %81 {offsets = [3, 0, 0], sizes = [1, 2, 96], strides = [1, 1, 1]} : vector<8x2x96xf32> to vector<1x2x96xf32>
    %174 = vector.shape_cast %173 : vector<1x2x96xf32> to vector<2x96xf32>
    %cst_59 = arith.constant dense<0.000000e+00> : vector<2x96xf32>
    %175 = tpu.matmul %172, %63, %cst_59 {dimension_numbers = #tpu.dot_dimension_numbers<[1], [0], [0], [1], [0, 0, 1, 1], [], []>} : vector<2x32xf32>, vector<32x96xf32>, vector<2x96xf32> -> vector<2x96xf32>
    %176 = vector.extract_strided_slice %174 {offsets = [0, 0], sizes = [2, 32], strides = [1, 1]} : vector<2x96xf32> to vector<2x32xf32>
    %177 = vector.extract_strided_slice %175 {offsets = [0, 0], sizes = [2, 32], strides = [1, 1]} : vector<2x96xf32> to vector<2x32xf32>
    %178 = arith.addf %176, %177 : vector<2x32xf32>
    %179 = arith.negf %178 : vector<2x32xf32>
    %180 = math.exp %179 : vector<2x32xf32>
    %cst_60 = arith.constant 1.000000e+00 : f32
    %181 = vector.broadcast %cst_60 : f32 to vector<2x32xf32>
    %182 = arith.addf %181, %180 : vector<2x32xf32>
    %183 = arith.divf %181, %182 : vector<2x32xf32>
    %184 = vector.extract_strided_slice %174 {offsets = [0, 32], sizes = [2, 32], strides = [1, 1]} : vector<2x96xf32> to vector<2x32xf32>
    %185 = vector.extract_strided_slice %175 {offsets = [0, 32], sizes = [2, 32], strides = [1, 1]} : vector<2x96xf32> to vector<2x32xf32>
    %186 = arith.addf %184, %185 : vector<2x32xf32>
    %187 = arith.negf %186 : vector<2x32xf32>
    %188 = math.exp %187 : vector<2x32xf32>
    %cst_61 = arith.constant 1.000000e+00 : f32
    %189 = vector.broadcast %cst_61 : f32 to vector<2x32xf32>
    %190 = arith.addf %189, %188 : vector<2x32xf32>
    %191 = arith.divf %189, %190 : vector<2x32xf32>
    %192 = vector.extract_strided_slice %174 {offsets = [0, 64], sizes = [2, 32], strides = [1, 1]} : vector<2x96xf32> to vector<2x32xf32>
    %193 = vector.extract_strided_slice %175 {offsets = [0, 64], sizes = [2, 32], strides = [1, 1]} : vector<2x96xf32> to vector<2x32xf32>
    %194 = arith.addf %193, %72 : vector<2x32xf32>
    %195 = arith.mulf %183, %194 : vector<2x32xf32>
    %196 = arith.addf %192, %195 : vector<2x32xf32>
    %197 = math.tanh %196 : vector<2x32xf32>
    %cst_62 = arith.constant 1.000000e+00 : f32
    %198 = vector.broadcast %cst_62 : f32 to vector<2x32xf32>
    %199 = arith.subf %198, %191 : vector<2x32xf32>
    %200 = arith.mulf %199, %197 : vector<2x32xf32>
    %201 = arith.mulf %191, %172 : vector<2x32xf32>
    %202 = arith.addf %200, %201 : vector<2x32xf32>
    %203 = vector.extract_strided_slice %81 {offsets = [4, 0, 0], sizes = [1, 2, 96], strides = [1, 1, 1]} : vector<8x2x96xf32> to vector<1x2x96xf32>
    %204 = vector.shape_cast %203 : vector<1x2x96xf32> to vector<2x96xf32>
    %cst_63 = arith.constant dense<0.000000e+00> : vector<2x96xf32>
    %205 = tpu.matmul %202, %63, %cst_63 {dimension_numbers = #tpu.dot_dimension_numbers<[1], [0], [0], [1], [0, 0, 1, 1], [], []>} : vector<2x32xf32>, vector<32x96xf32>, vector<2x96xf32> -> vector<2x96xf32>
    %206 = vector.extract_strided_slice %204 {offsets = [0, 0], sizes = [2, 32], strides = [1, 1]} : vector<2x96xf32> to vector<2x32xf32>
    %207 = vector.extract_strided_slice %205 {offsets = [0, 0], sizes = [2, 32], strides = [1, 1]} : vector<2x96xf32> to vector<2x32xf32>
    %208 = arith.addf %206, %207 : vector<2x32xf32>
    %209 = arith.negf %208 : vector<2x32xf32>
    %210 = math.exp %209 : vector<2x32xf32>
    %cst_64 = arith.constant 1.000000e+00 : f32
    %211 = vector.broadcast %cst_64 : f32 to vector<2x32xf32>
    %212 = arith.addf %211, %210 : vector<2x32xf32>
    %213 = arith.divf %211, %212 : vector<2x32xf32>
    %214 = vector.extract_strided_slice %204 {offsets = [0, 32], sizes = [2, 32], strides = [1, 1]} : vector<2x96xf32> to vector<2x32xf32>
    %215 = vector.extract_strided_slice %205 {offsets = [0, 32], sizes = [2, 32], strides = [1, 1]} : vector<2x96xf32> to vector<2x32xf32>
    %216 = arith.addf %214, %215 : vector<2x32xf32>
    %217 = arith.negf %216 : vector<2x32xf32>
    %218 = math.exp %217 : vector<2x32xf32>
    %cst_65 = arith.constant 1.000000e+00 : f32
    %219 = vector.broadcast %cst_65 : f32 to vector<2x32xf32>
    %220 = arith.addf %219, %218 : vector<2x32xf32>
    %221 = arith.divf %219, %220 : vector<2x32xf32>
    %222 = vector.extract_strided_slice %204 {offsets = [0, 64], sizes = [2, 32], strides = [1, 1]} : vector<2x96xf32> to vector<2x32xf32>
    %223 = vector.extract_strided_slice %205 {offsets = [0, 64], sizes = [2, 32], strides = [1, 1]} : vector<2x96xf32> to vector<2x32xf32>
    %224 = arith.addf %223, %72 : vector<2x32xf32>
    %225 = arith.mulf %213, %224 : vector<2x32xf32>
    %226 = arith.addf %222, %225 : vector<2x32xf32>
    %227 = math.tanh %226 : vector<2x32xf32>
    %cst_66 = arith.constant 1.000000e+00 : f32
    %228 = vector.broadcast %cst_66 : f32 to vector<2x32xf32>
    %229 = arith.subf %228, %221 : vector<2x32xf32>
    %230 = arith.mulf %229, %227 : vector<2x32xf32>
    %231 = arith.mulf %221, %202 : vector<2x32xf32>
    %232 = arith.addf %230, %231 : vector<2x32xf32>
    %233 = vector.extract_strided_slice %81 {offsets = [5, 0, 0], sizes = [1, 2, 96], strides = [1, 1, 1]} : vector<8x2x96xf32> to vector<1x2x96xf32>
    %234 = vector.shape_cast %233 : vector<1x2x96xf32> to vector<2x96xf32>
    %cst_67 = arith.constant dense<0.000000e+00> : vector<2x96xf32>
    %235 = tpu.matmul %232, %63, %cst_67 {dimension_numbers = #tpu.dot_dimension_numbers<[1], [0], [0], [1], [0, 0, 1, 1], [], []>} : vector<2x32xf32>, vector<32x96xf32>, vector<2x96xf32> -> vector<2x96xf32>
    %236 = vector.extract_strided_slice %234 {offsets = [0, 0], sizes = [2, 32], strides = [1, 1]} : vector<2x96xf32> to vector<2x32xf32>
    %237 = vector.extract_strided_slice %235 {offsets = [0, 0], sizes = [2, 32], strides = [1, 1]} : vector<2x96xf32> to vector<2x32xf32>
    %238 = arith.addf %236, %237 : vector<2x32xf32>
    %239 = arith.negf %238 : vector<2x32xf32>
    %240 = math.exp %239 : vector<2x32xf32>
    %cst_68 = arith.constant 1.000000e+00 : f32
    %241 = vector.broadcast %cst_68 : f32 to vector<2x32xf32>
    %242 = arith.addf %241, %240 : vector<2x32xf32>
    %243 = arith.divf %241, %242 : vector<2x32xf32>
    %244 = vector.extract_strided_slice %234 {offsets = [0, 32], sizes = [2, 32], strides = [1, 1]} : vector<2x96xf32> to vector<2x32xf32>
    %245 = vector.extract_strided_slice %235 {offsets = [0, 32], sizes = [2, 32], strides = [1, 1]} : vector<2x96xf32> to vector<2x32xf32>
    %246 = arith.addf %244, %245 : vector<2x32xf32>
    %247 = arith.negf %246 : vector<2x32xf32>
    %248 = math.exp %247 : vector<2x32xf32>
    %cst_69 = arith.constant 1.000000e+00 : f32
    %249 = vector.broadcast %cst_69 : f32 to vector<2x32xf32>
    %250 = arith.addf %249, %248 : vector<2x32xf32>
    %251 = arith.divf %249, %250 : vector<2x32xf32>
    %252 = vector.extract_strided_slice %234 {offsets = [0, 64], sizes = [2, 32], strides = [1, 1]} : vector<2x96xf32> to vector<2x32xf32>
    %253 = vector.extract_strided_slice %235 {offsets = [0, 64], sizes = [2, 32], strides = [1, 1]} : vector<2x96xf32> to vector<2x32xf32>
    %254 = arith.addf %253, %72 : vector<2x32xf32>
    %255 = arith.mulf %243, %254 : vector<2x32xf32>
    %256 = arith.addf %252, %255 : vector<2x32xf32>
    %257 = math.tanh %256 : vector<2x32xf32>
    %cst_70 = arith.constant 1.000000e+00 : f32
    %258 = vector.broadcast %cst_70 : f32 to vector<2x32xf32>
    %259 = arith.subf %258, %251 : vector<2x32xf32>
    %260 = arith.mulf %259, %257 : vector<2x32xf32>
    %261 = arith.mulf %251, %232 : vector<2x32xf32>
    %262 = arith.addf %260, %261 : vector<2x32xf32>
    %263 = vector.extract_strided_slice %81 {offsets = [6, 0, 0], sizes = [1, 2, 96], strides = [1, 1, 1]} : vector<8x2x96xf32> to vector<1x2x96xf32>
    %264 = vector.shape_cast %263 : vector<1x2x96xf32> to vector<2x96xf32>
    %cst_71 = arith.constant dense<0.000000e+00> : vector<2x96xf32>
    %265 = tpu.matmul %262, %63, %cst_71 {dimension_numbers = #tpu.dot_dimension_numbers<[1], [0], [0], [1], [0, 0, 1, 1], [], []>} : vector<2x32xf32>, vector<32x96xf32>, vector<2x96xf32> -> vector<2x96xf32>
    %266 = vector.extract_strided_slice %264 {offsets = [0, 0], sizes = [2, 32], strides = [1, 1]} : vector<2x96xf32> to vector<2x32xf32>
    %267 = vector.extract_strided_slice %265 {offsets = [0, 0], sizes = [2, 32], strides = [1, 1]} : vector<2x96xf32> to vector<2x32xf32>
    %268 = arith.addf %266, %267 : vector<2x32xf32>
    %269 = arith.negf %268 : vector<2x32xf32>
    %270 = math.exp %269 : vector<2x32xf32>
    %cst_72 = arith.constant 1.000000e+00 : f32
    %271 = vector.broadcast %cst_72 : f32 to vector<2x32xf32>
    %272 = arith.addf %271, %270 : vector<2x32xf32>
    %273 = arith.divf %271, %272 : vector<2x32xf32>
    %274 = vector.extract_strided_slice %264 {offsets = [0, 32], sizes = [2, 32], strides = [1, 1]} : vector<2x96xf32> to vector<2x32xf32>
    %275 = vector.extract_strided_slice %265 {offsets = [0, 32], sizes = [2, 32], strides = [1, 1]} : vector<2x96xf32> to vector<2x32xf32>
    %276 = arith.addf %274, %275 : vector<2x32xf32>
    %277 = arith.negf %276 : vector<2x32xf32>
    %278 = math.exp %277 : vector<2x32xf32>
    %cst_73 = arith.constant 1.000000e+00 : f32
    %279 = vector.broadcast %cst_73 : f32 to vector<2x32xf32>
    %280 = arith.addf %279, %278 : vector<2x32xf32>
    %281 = arith.divf %279, %280 : vector<2x32xf32>
    %282 = vector.extract_strided_slice %264 {offsets = [0, 64], sizes = [2, 32], strides = [1, 1]} : vector<2x96xf32> to vector<2x32xf32>
    %283 = vector.extract_strided_slice %265 {offsets = [0, 64], sizes = [2, 32], strides = [1, 1]} : vector<2x96xf32> to vector<2x32xf32>
    %284 = arith.addf %283, %72 : vector<2x32xf32>
    %285 = arith.mulf %273, %284 : vector<2x32xf32>
    %286 = arith.addf %282, %285 : vector<2x32xf32>
    %287 = math.tanh %286 : vector<2x32xf32>
    %cst_74 = arith.constant 1.000000e+00 : f32
    %288 = vector.broadcast %cst_74 : f32 to vector<2x32xf32>
    %289 = arith.subf %288, %281 : vector<2x32xf32>
    %290 = arith.mulf %289, %287 : vector<2x32xf32>
    %291 = arith.mulf %281, %262 : vector<2x32xf32>
    %292 = arith.addf %290, %291 : vector<2x32xf32>
    %293 = vector.extract_strided_slice %81 {offsets = [7, 0, 0], sizes = [1, 2, 96], strides = [1, 1, 1]} : vector<8x2x96xf32> to vector<1x2x96xf32>
    %294 = vector.shape_cast %293 : vector<1x2x96xf32> to vector<2x96xf32>
    %cst_75 = arith.constant dense<0.000000e+00> : vector<2x96xf32>
    %295 = tpu.matmul %292, %63, %cst_75 {dimension_numbers = #tpu.dot_dimension_numbers<[1], [0], [0], [1], [0, 0, 1, 1], [], []>} : vector<2x32xf32>, vector<32x96xf32>, vector<2x96xf32> -> vector<2x96xf32>
    %296 = vector.extract_strided_slice %294 {offsets = [0, 0], sizes = [2, 32], strides = [1, 1]} : vector<2x96xf32> to vector<2x32xf32>
    %297 = vector.extract_strided_slice %295 {offsets = [0, 0], sizes = [2, 32], strides = [1, 1]} : vector<2x96xf32> to vector<2x32xf32>
    %298 = arith.addf %296, %297 : vector<2x32xf32>
    %299 = arith.negf %298 : vector<2x32xf32>
    %300 = math.exp %299 : vector<2x32xf32>
    %cst_76 = arith.constant 1.000000e+00 : f32
    %301 = vector.broadcast %cst_76 : f32 to vector<2x32xf32>
    %302 = arith.addf %301, %300 : vector<2x32xf32>
    %303 = arith.divf %301, %302 : vector<2x32xf32>
    %304 = vector.extract_strided_slice %294 {offsets = [0, 32], sizes = [2, 32], strides = [1, 1]} : vector<2x96xf32> to vector<2x32xf32>
    %305 = vector.extract_strided_slice %295 {offsets = [0, 32], sizes = [2, 32], strides = [1, 1]} : vector<2x96xf32> to vector<2x32xf32>
    %306 = arith.addf %304, %305 : vector<2x32xf32>
    %307 = arith.negf %306 : vector<2x32xf32>
    %308 = math.exp %307 : vector<2x32xf32>
    %cst_77 = arith.constant 1.000000e+00 : f32
    %309 = vector.broadcast %cst_77 : f32 to vector<2x32xf32>
    %310 = arith.addf %309, %308 : vector<2x32xf32>
    %311 = arith.divf %309, %310 : vector<2x32xf32>
    %312 = vector.extract_strided_slice %294 {offsets = [0, 64], sizes = [2, 32], strides = [1, 1]} : vector<2x96xf32> to vector<2x32xf32>
    %313 = vector.extract_strided_slice %295 {offsets = [0, 64], sizes = [2, 32], strides = [1, 1]} : vector<2x96xf32> to vector<2x32xf32>
    %314 = arith.addf %313, %72 : vector<2x32xf32>
    %315 = arith.mulf %303, %314 : vector<2x32xf32>
    %316 = arith.addf %312, %315 : vector<2x32xf32>
    %317 = math.tanh %316 : vector<2x32xf32>
    %cst_78 = arith.constant 1.000000e+00 : f32
    %318 = vector.broadcast %cst_78 : f32 to vector<2x32xf32>
    %319 = arith.subf %318, %311 : vector<2x32xf32>
    %320 = arith.mulf %319, %317 : vector<2x32xf32>
    %321 = arith.mulf %311, %292 : vector<2x32xf32>
    %322 = arith.addf %320, %321 : vector<2x32xf32>
    %323 = vector.shape_cast %43 : vector<8x2x3xf32> to vector<16x3xf32>
    %cst_79 = arith.constant dense<0.000000e+00> : vector<16x96xf32>
    %324 = tpu.matmul %323, %65, %cst_79 {dimension_numbers = #tpu.dot_dimension_numbers<[1], [0], [0], [1], [0, 0, 1, 1], [], []>} : vector<16x3xf32>, vector<3x96xf32>, vector<16x96xf32> -> vector<16x96xf32>
    %325 = vector.broadcast %67 : vector<1x96xf32> to vector<16x96xf32>
    %326 = arith.addf %324, %325 : vector<16x96xf32>
    %327 = vector.shape_cast %326 : vector<16x96xf32> to vector<8x2x96xf32>
    %328 = vector.extract_strided_slice %327 {offsets = [0, 0, 0], sizes = [1, 2, 96], strides = [1, 1, 1]} : vector<8x2x96xf32> to vector<1x2x96xf32>
    %329 = vector.shape_cast %328 : vector<1x2x96xf32> to vector<2x96xf32>
    %cst_80 = arith.constant dense<0.000000e+00> : vector<2x96xf32>
    %330 = tpu.matmul %322, %66, %cst_80 {dimension_numbers = #tpu.dot_dimension_numbers<[1], [0], [0], [1], [0, 0, 1, 1], [], []>} : vector<2x32xf32>, vector<32x96xf32>, vector<2x96xf32> -> vector<2x96xf32>
    %331 = vector.extract_strided_slice %329 {offsets = [0, 0], sizes = [2, 32], strides = [1, 1]} : vector<2x96xf32> to vector<2x32xf32>
    %332 = vector.extract_strided_slice %330 {offsets = [0, 0], sizes = [2, 32], strides = [1, 1]} : vector<2x96xf32> to vector<2x32xf32>
    %333 = arith.addf %331, %332 : vector<2x32xf32>
    %334 = arith.negf %333 : vector<2x32xf32>
    %335 = math.exp %334 : vector<2x32xf32>
    %cst_81 = arith.constant 1.000000e+00 : f32
    %336 = vector.broadcast %cst_81 : f32 to vector<2x32xf32>
    %337 = arith.addf %336, %335 : vector<2x32xf32>
    %338 = arith.divf %336, %337 : vector<2x32xf32>
    %339 = vector.extract_strided_slice %329 {offsets = [0, 32], sizes = [2, 32], strides = [1, 1]} : vector<2x96xf32> to vector<2x32xf32>
    %340 = vector.extract_strided_slice %330 {offsets = [0, 32], sizes = [2, 32], strides = [1, 1]} : vector<2x96xf32> to vector<2x32xf32>
    %341 = arith.addf %339, %340 : vector<2x32xf32>
    %342 = arith.negf %341 : vector<2x32xf32>
    %343 = math.exp %342 : vector<2x32xf32>
    %cst_82 = arith.constant 1.000000e+00 : f32
    %344 = vector.broadcast %cst_82 : f32 to vector<2x32xf32>
    %345 = arith.addf %344, %343 : vector<2x32xf32>
    %346 = arith.divf %344, %345 : vector<2x32xf32>
    %347 = vector.extract_strided_slice %329 {offsets = [0, 64], sizes = [2, 32], strides = [1, 1]} : vector<2x96xf32> to vector<2x32xf32>
    %348 = vector.extract_strided_slice %330 {offsets = [0, 64], sizes = [2, 32], strides = [1, 1]} : vector<2x96xf32> to vector<2x32xf32>
    %349 = arith.addf %348, %75 : vector<2x32xf32>
    %350 = arith.mulf %338, %349 : vector<2x32xf32>
    %351 = arith.addf %347, %350 : vector<2x32xf32>
    %352 = math.tanh %351 : vector<2x32xf32>
    %cst_83 = arith.constant 1.000000e+00 : f32
    %353 = vector.broadcast %cst_83 : f32 to vector<2x32xf32>
    %354 = arith.subf %353, %346 : vector<2x32xf32>
    %355 = arith.mulf %354, %352 : vector<2x32xf32>
    %356 = arith.mulf %346, %322 : vector<2x32xf32>
    %357 = arith.addf %355, %356 : vector<2x32xf32>
    %358 = vector.extract_strided_slice %327 {offsets = [1, 0, 0], sizes = [1, 2, 96], strides = [1, 1, 1]} : vector<8x2x96xf32> to vector<1x2x96xf32>
    %359 = vector.shape_cast %358 : vector<1x2x96xf32> to vector<2x96xf32>
    %cst_84 = arith.constant dense<0.000000e+00> : vector<2x96xf32>
    %360 = tpu.matmul %357, %66, %cst_84 {dimension_numbers = #tpu.dot_dimension_numbers<[1], [0], [0], [1], [0, 0, 1, 1], [], []>} : vector<2x32xf32>, vector<32x96xf32>, vector<2x96xf32> -> vector<2x96xf32>
    %361 = vector.extract_strided_slice %359 {offsets = [0, 0], sizes = [2, 32], strides = [1, 1]} : vector<2x96xf32> to vector<2x32xf32>
    %362 = vector.extract_strided_slice %360 {offsets = [0, 0], sizes = [2, 32], strides = [1, 1]} : vector<2x96xf32> to vector<2x32xf32>
    %363 = arith.addf %361, %362 : vector<2x32xf32>
    %364 = arith.negf %363 : vector<2x32xf32>
    %365 = math.exp %364 : vector<2x32xf32>
    %cst_85 = arith.constant 1.000000e+00 : f32
    %366 = vector.broadcast %cst_85 : f32 to vector<2x32xf32>
    %367 = arith.addf %366, %365 : vector<2x32xf32>
    %368 = arith.divf %366, %367 : vector<2x32xf32>
    %369 = vector.extract_strided_slice %359 {offsets = [0, 32], sizes = [2, 32], strides = [1, 1]} : vector<2x96xf32> to vector<2x32xf32>
    %370 = vector.extract_strided_slice %360 {offsets = [0, 32], sizes = [2, 32], strides = [1, 1]} : vector<2x96xf32> to vector<2x32xf32>
    %371 = arith.addf %369, %370 : vector<2x32xf32>
    %372 = arith.negf %371 : vector<2x32xf32>
    %373 = math.exp %372 : vector<2x32xf32>
    %cst_86 = arith.constant 1.000000e+00 : f32
    %374 = vector.broadcast %cst_86 : f32 to vector<2x32xf32>
    %375 = arith.addf %374, %373 : vector<2x32xf32>
    %376 = arith.divf %374, %375 : vector<2x32xf32>
    %377 = vector.extract_strided_slice %359 {offsets = [0, 64], sizes = [2, 32], strides = [1, 1]} : vector<2x96xf32> to vector<2x32xf32>
    %378 = vector.extract_strided_slice %360 {offsets = [0, 64], sizes = [2, 32], strides = [1, 1]} : vector<2x96xf32> to vector<2x32xf32>
    %379 = arith.addf %378, %75 : vector<2x32xf32>
    %380 = arith.mulf %368, %379 : vector<2x32xf32>
    %381 = arith.addf %377, %380 : vector<2x32xf32>
    %382 = math.tanh %381 : vector<2x32xf32>
    %cst_87 = arith.constant 1.000000e+00 : f32
    %383 = vector.broadcast %cst_87 : f32 to vector<2x32xf32>
    %384 = arith.subf %383, %376 : vector<2x32xf32>
    %385 = arith.mulf %384, %382 : vector<2x32xf32>
    %386 = arith.mulf %376, %357 : vector<2x32xf32>
    %387 = arith.addf %385, %386 : vector<2x32xf32>
    %388 = vector.extract_strided_slice %327 {offsets = [2, 0, 0], sizes = [1, 2, 96], strides = [1, 1, 1]} : vector<8x2x96xf32> to vector<1x2x96xf32>
    %389 = vector.shape_cast %388 : vector<1x2x96xf32> to vector<2x96xf32>
    %cst_88 = arith.constant dense<0.000000e+00> : vector<2x96xf32>
    %390 = tpu.matmul %387, %66, %cst_88 {dimension_numbers = #tpu.dot_dimension_numbers<[1], [0], [0], [1], [0, 0, 1, 1], [], []>} : vector<2x32xf32>, vector<32x96xf32>, vector<2x96xf32> -> vector<2x96xf32>
    %391 = vector.extract_strided_slice %389 {offsets = [0, 0], sizes = [2, 32], strides = [1, 1]} : vector<2x96xf32> to vector<2x32xf32>
    %392 = vector.extract_strided_slice %390 {offsets = [0, 0], sizes = [2, 32], strides = [1, 1]} : vector<2x96xf32> to vector<2x32xf32>
    %393 = arith.addf %391, %392 : vector<2x32xf32>
    %394 = arith.negf %393 : vector<2x32xf32>
    %395 = math.exp %394 : vector<2x32xf32>
    %cst_89 = arith.constant 1.000000e+00 : f32
    %396 = vector.broadcast %cst_89 : f32 to vector<2x32xf32>
    %397 = arith.addf %396, %395 : vector<2x32xf32>
    %398 = arith.divf %396, %397 : vector<2x32xf32>
    %399 = vector.extract_strided_slice %389 {offsets = [0, 32], sizes = [2, 32], strides = [1, 1]} : vector<2x96xf32> to vector<2x32xf32>
    %400 = vector.extract_strided_slice %390 {offsets = [0, 32], sizes = [2, 32], strides = [1, 1]} : vector<2x96xf32> to vector<2x32xf32>
    %401 = arith.addf %399, %400 : vector<2x32xf32>
    %402 = arith.negf %401 : vector<2x32xf32>
    %403 = math.exp %402 : vector<2x32xf32>
    %cst_90 = arith.constant 1.000000e+00 : f32
    %404 = vector.broadcast %cst_90 : f32 to vector<2x32xf32>
    %405 = arith.addf %404, %403 : vector<2x32xf32>
    %406 = arith.divf %404, %405 : vector<2x32xf32>
    %407 = vector.extract_strided_slice %389 {offsets = [0, 64], sizes = [2, 32], strides = [1, 1]} : vector<2x96xf32> to vector<2x32xf32>
    %408 = vector.extract_strided_slice %390 {offsets = [0, 64], sizes = [2, 32], strides = [1, 1]} : vector<2x96xf32> to vector<2x32xf32>
    %409 = arith.addf %408, %75 : vector<2x32xf32>
    %410 = arith.mulf %398, %409 : vector<2x32xf32>
    %411 = arith.addf %407, %410 : vector<2x32xf32>
    %412 = math.tanh %411 : vector<2x32xf32>
    %cst_91 = arith.constant 1.000000e+00 : f32
    %413 = vector.broadcast %cst_91 : f32 to vector<2x32xf32>
    %414 = arith.subf %413, %406 : vector<2x32xf32>
    %415 = arith.mulf %414, %412 : vector<2x32xf32>
    %416 = arith.mulf %406, %387 : vector<2x32xf32>
    %417 = arith.addf %415, %416 : vector<2x32xf32>
    %418 = vector.extract_strided_slice %327 {offsets = [3, 0, 0], sizes = [1, 2, 96], strides = [1, 1, 1]} : vector<8x2x96xf32> to vector<1x2x96xf32>
    %419 = vector.shape_cast %418 : vector<1x2x96xf32> to vector<2x96xf32>
    %cst_92 = arith.constant dense<0.000000e+00> : vector<2x96xf32>
    %420 = tpu.matmul %417, %66, %cst_92 {dimension_numbers = #tpu.dot_dimension_numbers<[1], [0], [0], [1], [0, 0, 1, 1], [], []>} : vector<2x32xf32>, vector<32x96xf32>, vector<2x96xf32> -> vector<2x96xf32>
    %421 = vector.extract_strided_slice %419 {offsets = [0, 0], sizes = [2, 32], strides = [1, 1]} : vector<2x96xf32> to vector<2x32xf32>
    %422 = vector.extract_strided_slice %420 {offsets = [0, 0], sizes = [2, 32], strides = [1, 1]} : vector<2x96xf32> to vector<2x32xf32>
    %423 = arith.addf %421, %422 : vector<2x32xf32>
    %424 = arith.negf %423 : vector<2x32xf32>
    %425 = math.exp %424 : vector<2x32xf32>
    %cst_93 = arith.constant 1.000000e+00 : f32
    %426 = vector.broadcast %cst_93 : f32 to vector<2x32xf32>
    %427 = arith.addf %426, %425 : vector<2x32xf32>
    %428 = arith.divf %426, %427 : vector<2x32xf32>
    %429 = vector.extract_strided_slice %419 {offsets = [0, 32], sizes = [2, 32], strides = [1, 1]} : vector<2x96xf32> to vector<2x32xf32>
    %430 = vector.extract_strided_slice %420 {offsets = [0, 32], sizes = [2, 32], strides = [1, 1]} : vector<2x96xf32> to vector<2x32xf32>
    %431 = arith.addf %429, %430 : vector<2x32xf32>
    %432 = arith.negf %431 : vector<2x32xf32>
    %433 = math.exp %432 : vector<2x32xf32>
    %cst_94 = arith.constant 1.000000e+00 : f32
    %434 = vector.broadcast %cst_94 : f32 to vector<2x32xf32>
    %435 = arith.addf %434, %433 : vector<2x32xf32>
    %436 = arith.divf %434, %435 : vector<2x32xf32>
    %437 = vector.extract_strided_slice %419 {offsets = [0, 64], sizes = [2, 32], strides = [1, 1]} : vector<2x96xf32> to vector<2x32xf32>
    %438 = vector.extract_strided_slice %420 {offsets = [0, 64], sizes = [2, 32], strides = [1, 1]} : vector<2x96xf32> to vector<2x32xf32>
    %439 = arith.addf %438, %75 : vector<2x32xf32>
    %440 = arith.mulf %428, %439 : vector<2x32xf32>
    %441 = arith.addf %437, %440 : vector<2x32xf32>
    %442 = math.tanh %441 : vector<2x32xf32>
    %cst_95 = arith.constant 1.000000e+00 : f32
    %443 = vector.broadcast %cst_95 : f32 to vector<2x32xf32>
    %444 = arith.subf %443, %436 : vector<2x32xf32>
    %445 = arith.mulf %444, %442 : vector<2x32xf32>
    %446 = arith.mulf %436, %417 : vector<2x32xf32>
    %447 = arith.addf %445, %446 : vector<2x32xf32>
    %448 = vector.extract_strided_slice %327 {offsets = [4, 0, 0], sizes = [1, 2, 96], strides = [1, 1, 1]} : vector<8x2x96xf32> to vector<1x2x96xf32>
    %449 = vector.shape_cast %448 : vector<1x2x96xf32> to vector<2x96xf32>
    %cst_96 = arith.constant dense<0.000000e+00> : vector<2x96xf32>
    %450 = tpu.matmul %447, %66, %cst_96 {dimension_numbers = #tpu.dot_dimension_numbers<[1], [0], [0], [1], [0, 0, 1, 1], [], []>} : vector<2x32xf32>, vector<32x96xf32>, vector<2x96xf32> -> vector<2x96xf32>
    %451 = vector.extract_strided_slice %449 {offsets = [0, 0], sizes = [2, 32], strides = [1, 1]} : vector<2x96xf32> to vector<2x32xf32>
    %452 = vector.extract_strided_slice %450 {offsets = [0, 0], sizes = [2, 32], strides = [1, 1]} : vector<2x96xf32> to vector<2x32xf32>
    %453 = arith.addf %451, %452 : vector<2x32xf32>
    %454 = arith.negf %453 : vector<2x32xf32>
    %455 = math.exp %454 : vector<2x32xf32>
    %cst_97 = arith.constant 1.000000e+00 : f32
    %456 = vector.broadcast %cst_97 : f32 to vector<2x32xf32>
    %457 = arith.addf %456, %455 : vector<2x32xf32>
    %458 = arith.divf %456, %457 : vector<2x32xf32>
    %459 = vector.extract_strided_slice %449 {offsets = [0, 32], sizes = [2, 32], strides = [1, 1]} : vector<2x96xf32> to vector<2x32xf32>
    %460 = vector.extract_strided_slice %450 {offsets = [0, 32], sizes = [2, 32], strides = [1, 1]} : vector<2x96xf32> to vector<2x32xf32>
    %461 = arith.addf %459, %460 : vector<2x32xf32>
    %462 = arith.negf %461 : vector<2x32xf32>
    %463 = math.exp %462 : vector<2x32xf32>
    %cst_98 = arith.constant 1.000000e+00 : f32
    %464 = vector.broadcast %cst_98 : f32 to vector<2x32xf32>
    %465 = arith.addf %464, %463 : vector<2x32xf32>
    %466 = arith.divf %464, %465 : vector<2x32xf32>
    %467 = vector.extract_strided_slice %449 {offsets = [0, 64], sizes = [2, 32], strides = [1, 1]} : vector<2x96xf32> to vector<2x32xf32>
    %468 = vector.extract_strided_slice %450 {offsets = [0, 64], sizes = [2, 32], strides = [1, 1]} : vector<2x96xf32> to vector<2x32xf32>
    %469 = arith.addf %468, %75 : vector<2x32xf32>
    %470 = arith.mulf %458, %469 : vector<2x32xf32>
    %471 = arith.addf %467, %470 : vector<2x32xf32>
    %472 = math.tanh %471 : vector<2x32xf32>
    %cst_99 = arith.constant 1.000000e+00 : f32
    %473 = vector.broadcast %cst_99 : f32 to vector<2x32xf32>
    %474 = arith.subf %473, %466 : vector<2x32xf32>
    %475 = arith.mulf %474, %472 : vector<2x32xf32>
    %476 = arith.mulf %466, %447 : vector<2x32xf32>
    %477 = arith.addf %475, %476 : vector<2x32xf32>
    %478 = vector.extract_strided_slice %327 {offsets = [5, 0, 0], sizes = [1, 2, 96], strides = [1, 1, 1]} : vector<8x2x96xf32> to vector<1x2x96xf32>
    %479 = vector.shape_cast %478 : vector<1x2x96xf32> to vector<2x96xf32>
    %cst_100 = arith.constant dense<0.000000e+00> : vector<2x96xf32>
    %480 = tpu.matmul %477, %66, %cst_100 {dimension_numbers = #tpu.dot_dimension_numbers<[1], [0], [0], [1], [0, 0, 1, 1], [], []>} : vector<2x32xf32>, vector<32x96xf32>, vector<2x96xf32> -> vector<2x96xf32>
    %481 = vector.extract_strided_slice %479 {offsets = [0, 0], sizes = [2, 32], strides = [1, 1]} : vector<2x96xf32> to vector<2x32xf32>
    %482 = vector.extract_strided_slice %480 {offsets = [0, 0], sizes = [2, 32], strides = [1, 1]} : vector<2x96xf32> to vector<2x32xf32>
    %483 = arith.addf %481, %482 : vector<2x32xf32>
    %484 = arith.negf %483 : vector<2x32xf32>
    %485 = math.exp %484 : vector<2x32xf32>
    %cst_101 = arith.constant 1.000000e+00 : f32
    %486 = vector.broadcast %cst_101 : f32 to vector<2x32xf32>
    %487 = arith.addf %486, %485 : vector<2x32xf32>
    %488 = arith.divf %486, %487 : vector<2x32xf32>
    %489 = vector.extract_strided_slice %479 {offsets = [0, 32], sizes = [2, 32], strides = [1, 1]} : vector<2x96xf32> to vector<2x32xf32>
    %490 = vector.extract_strided_slice %480 {offsets = [0, 32], sizes = [2, 32], strides = [1, 1]} : vector<2x96xf32> to vector<2x32xf32>
    %491 = arith.addf %489, %490 : vector<2x32xf32>
    %492 = arith.negf %491 : vector<2x32xf32>
    %493 = math.exp %492 : vector<2x32xf32>
    %cst_102 = arith.constant 1.000000e+00 : f32
    %494 = vector.broadcast %cst_102 : f32 to vector<2x32xf32>
    %495 = arith.addf %494, %493 : vector<2x32xf32>
    %496 = arith.divf %494, %495 : vector<2x32xf32>
    %497 = vector.extract_strided_slice %479 {offsets = [0, 64], sizes = [2, 32], strides = [1, 1]} : vector<2x96xf32> to vector<2x32xf32>
    %498 = vector.extract_strided_slice %480 {offsets = [0, 64], sizes = [2, 32], strides = [1, 1]} : vector<2x96xf32> to vector<2x32xf32>
    %499 = arith.addf %498, %75 : vector<2x32xf32>
    %500 = arith.mulf %488, %499 : vector<2x32xf32>
    %501 = arith.addf %497, %500 : vector<2x32xf32>
    %502 = math.tanh %501 : vector<2x32xf32>
    %cst_103 = arith.constant 1.000000e+00 : f32
    %503 = vector.broadcast %cst_103 : f32 to vector<2x32xf32>
    %504 = arith.subf %503, %496 : vector<2x32xf32>
    %505 = arith.mulf %504, %502 : vector<2x32xf32>
    %506 = arith.mulf %496, %477 : vector<2x32xf32>
    %507 = arith.addf %505, %506 : vector<2x32xf32>
    %508 = vector.extract_strided_slice %327 {offsets = [6, 0, 0], sizes = [1, 2, 96], strides = [1, 1, 1]} : vector<8x2x96xf32> to vector<1x2x96xf32>
    %509 = vector.shape_cast %508 : vector<1x2x96xf32> to vector<2x96xf32>
    %cst_104 = arith.constant dense<0.000000e+00> : vector<2x96xf32>
    %510 = tpu.matmul %507, %66, %cst_104 {dimension_numbers = #tpu.dot_dimension_numbers<[1], [0], [0], [1], [0, 0, 1, 1], [], []>} : vector<2x32xf32>, vector<32x96xf32>, vector<2x96xf32> -> vector<2x96xf32>
    %511 = vector.extract_strided_slice %509 {offsets = [0, 0], sizes = [2, 32], strides = [1, 1]} : vector<2x96xf32> to vector<2x32xf32>
    %512 = vector.extract_strided_slice %510 {offsets = [0, 0], sizes = [2, 32], strides = [1, 1]} : vector<2x96xf32> to vector<2x32xf32>
    %513 = arith.addf %511, %512 : vector<2x32xf32>
    %514 = arith.negf %513 : vector<2x32xf32>
    %515 = math.exp %514 : vector<2x32xf32>
    %cst_105 = arith.constant 1.000000e+00 : f32
    %516 = vector.broadcast %cst_105 : f32 to vector<2x32xf32>
    %517 = arith.addf %516, %515 : vector<2x32xf32>
    %518 = arith.divf %516, %517 : vector<2x32xf32>
    %519 = vector.extract_strided_slice %509 {offsets = [0, 32], sizes = [2, 32], strides = [1, 1]} : vector<2x96xf32> to vector<2x32xf32>
    %520 = vector.extract_strided_slice %510 {offsets = [0, 32], sizes = [2, 32], strides = [1, 1]} : vector<2x96xf32> to vector<2x32xf32>
    %521 = arith.addf %519, %520 : vector<2x32xf32>
    %522 = arith.negf %521 : vector<2x32xf32>
    %523 = math.exp %522 : vector<2x32xf32>
    %cst_106 = arith.constant 1.000000e+00 : f32
    %524 = vector.broadcast %cst_106 : f32 to vector<2x32xf32>
    %525 = arith.addf %524, %523 : vector<2x32xf32>
    %526 = arith.divf %524, %525 : vector<2x32xf32>
    %527 = vector.extract_strided_slice %509 {offsets = [0, 64], sizes = [2, 32], strides = [1, 1]} : vector<2x96xf32> to vector<2x32xf32>
    %528 = vector.extract_strided_slice %510 {offsets = [0, 64], sizes = [2, 32], strides = [1, 1]} : vector<2x96xf32> to vector<2x32xf32>
    %529 = arith.addf %528, %75 : vector<2x32xf32>
    %530 = arith.mulf %518, %529 : vector<2x32xf32>
    %531 = arith.addf %527, %530 : vector<2x32xf32>
    %532 = math.tanh %531 : vector<2x32xf32>
    %cst_107 = arith.constant 1.000000e+00 : f32
    %533 = vector.broadcast %cst_107 : f32 to vector<2x32xf32>
    %534 = arith.subf %533, %526 : vector<2x32xf32>
    %535 = arith.mulf %534, %532 : vector<2x32xf32>
    %536 = arith.mulf %526, %507 : vector<2x32xf32>
    %537 = arith.addf %535, %536 : vector<2x32xf32>
    %538 = vector.extract_strided_slice %327 {offsets = [7, 0, 0], sizes = [1, 2, 96], strides = [1, 1, 1]} : vector<8x2x96xf32> to vector<1x2x96xf32>
    %539 = vector.shape_cast %538 : vector<1x2x96xf32> to vector<2x96xf32>
    %cst_108 = arith.constant dense<0.000000e+00> : vector<2x96xf32>
    %540 = tpu.matmul %537, %66, %cst_108 {dimension_numbers = #tpu.dot_dimension_numbers<[1], [0], [0], [1], [0, 0, 1, 1], [], []>} : vector<2x32xf32>, vector<32x96xf32>, vector<2x96xf32> -> vector<2x96xf32>
    %541 = vector.extract_strided_slice %539 {offsets = [0, 0], sizes = [2, 32], strides = [1, 1]} : vector<2x96xf32> to vector<2x32xf32>
    %542 = vector.extract_strided_slice %540 {offsets = [0, 0], sizes = [2, 32], strides = [1, 1]} : vector<2x96xf32> to vector<2x32xf32>
    %543 = arith.addf %541, %542 : vector<2x32xf32>
    %544 = arith.negf %543 : vector<2x32xf32>
    %545 = math.exp %544 : vector<2x32xf32>
    %cst_109 = arith.constant 1.000000e+00 : f32
    %546 = vector.broadcast %cst_109 : f32 to vector<2x32xf32>
    %547 = arith.addf %546, %545 : vector<2x32xf32>
    %548 = arith.divf %546, %547 : vector<2x32xf32>
    %549 = vector.extract_strided_slice %539 {offsets = [0, 32], sizes = [2, 32], strides = [1, 1]} : vector<2x96xf32> to vector<2x32xf32>
    %550 = vector.extract_strided_slice %540 {offsets = [0, 32], sizes = [2, 32], strides = [1, 1]} : vector<2x96xf32> to vector<2x32xf32>
    %551 = arith.addf %549, %550 : vector<2x32xf32>
    %552 = arith.negf %551 : vector<2x32xf32>
    %553 = math.exp %552 : vector<2x32xf32>
    %cst_110 = arith.constant 1.000000e+00 : f32
    %554 = vector.broadcast %cst_110 : f32 to vector<2x32xf32>
    %555 = arith.addf %554, %553 : vector<2x32xf32>
    %556 = arith.divf %554, %555 : vector<2x32xf32>
    %557 = vector.extract_strided_slice %539 {offsets = [0, 64], sizes = [2, 32], strides = [1, 1]} : vector<2x96xf32> to vector<2x32xf32>
    %558 = vector.extract_strided_slice %540 {offsets = [0, 64], sizes = [2, 32], strides = [1, 1]} : vector<2x96xf32> to vector<2x32xf32>
    %559 = arith.addf %558, %75 : vector<2x32xf32>
    %560 = arith.mulf %548, %559 : vector<2x32xf32>
    %561 = arith.addf %557, %560 : vector<2x32xf32>
    %562 = math.tanh %561 : vector<2x32xf32>
    %cst_111 = arith.constant 1.000000e+00 : f32
    %563 = vector.broadcast %cst_111 : f32 to vector<2x32xf32>
    %564 = arith.subf %563, %556 : vector<2x32xf32>
    %565 = arith.mulf %564, %562 : vector<2x32xf32>
    %566 = arith.mulf %556, %537 : vector<2x32xf32>
    %567 = arith.addf %565, %566 : vector<2x32xf32>
    %568 = vector.shape_cast %357 : vector<2x32xf32> to vector<1x2x32xf32>
    %569 = vector.shape_cast %387 : vector<2x32xf32> to vector<1x2x32xf32>
    %570 = vector.shape_cast %417 : vector<2x32xf32> to vector<1x2x32xf32>
    %571 = vector.shape_cast %447 : vector<2x32xf32> to vector<1x2x32xf32>
    %572 = vector.shape_cast %477 : vector<2x32xf32> to vector<1x2x32xf32>
    %573 = vector.shape_cast %507 : vector<2x32xf32> to vector<1x2x32xf32>
    %574 = vector.shape_cast %537 : vector<2x32xf32> to vector<1x2x32xf32>
    %575 = vector.shape_cast %567 : vector<2x32xf32> to vector<1x2x32xf32>
    %576 = tpu.concatenate %568, %569, %570, %571, %572, %573, %574, %575 in 0 : vector<1x2x32xf32>, vector<1x2x32xf32>, vector<1x2x32xf32>, vector<1x2x32xf32>, vector<1x2x32xf32>, vector<1x2x32xf32>, vector<1x2x32xf32>, vector<1x2x32xf32> -> vector<8x2x32xf32>
    %c0_112 = arith.constant 0 : index
    %c0_113 = arith.constant 0 : index
    %c0_114 = arith.constant 0 : index
    %577 = vector.load %arg15[%c0_112, %c0_113, %c0_114] : memref<8x2x32xf32, #tpu.memory_space<vmem>>, vector<8x2x32xf32>
    tpu.vector_store %arg15[%c0_112, %c0_113, %c0_114], %576 {strides = array<i32>} : memref<8x2x32xf32, #tpu.memory_space<vmem>>, vector<8x2x32xf32>,
    %578 = vector.shape_cast %576 : vector<8x2x32xf32> to vector<16x32xf32>
    %cst_115 = arith.constant dense<0.000000e+00> : vector<16x2xf32>
    %579 = tpu.matmul %578, %68, %cst_115 {dimension_numbers = #tpu.dot_dimension_numbers<[1], [0], [0], [1], [0, 0, 1, 1], [], []>} : vector<16x32xf32>, vector<32x2xf32>, vector<16x2xf32> -> vector<16x2xf32>
    %580 = vector.broadcast %69 : vector<1x2xf32> to vector<16x2xf32>
    %581 = arith.addf %579, %580 : vector<16x2xf32>
    %582 = vector.shape_cast %581 : vector<16x2xf32> to vector<8x2x2xf32>
    %583 = vector.broadcast %57 : vector<1x2x2xf32> to vector<8x2x2xf32>
    %584 = arith.mulf %582, %583 : vector<8x2x2xf32>
    %585 = vector.broadcast %47 : vector<1x2x2xf32> to vector<8x2x2xf32>
    %586 = arith.addf %584, %585 : vector<8x2x2xf32>
    %c0_116 = arith.constant 0 : index
    %c0_117 = arith.constant 0 : index
    %c0_118 = arith.constant 0 : index
    %587 = vector.load %arg14[%c0_116, %c0_117, %c0_118] : memref<8x2x2xf32, #tpu.memory_space<vmem>>, vector<8x2x2xf32>
    tpu.vector_store %arg14[%c0_116, %c0_117, %c0_118], %586 {strides = array<i32>} : memref<8x2x2xf32, #tpu.memory_space<vmem>>, vector<8x2x2xf32>,
    return
  }
}

</mosaic_0001>

<bundles_post_ra>
// kernel: crn_forward.1
= control target key start
LH: loop header
LB: loop body
LE: loop exit
PB: predicated region body
PF: predicated region fallthrough
CT: control target
= control target key end

     0   :  { %vm141_vm0 = vcmask 17408   ;;  %vm216_vm1 = vcmask 9216   ;;  %s3386_s23 = smov 7   ;;  %vm447_vm4 = vcmask 1040384   ;;  %vm3387_vm5 = vmmov 1   ;;  %s3391_s21 = smov 64   ;;  %s4246_s1 = inlined_call_operand.vmem [shape: f32[8,2,3], index: 1, kind: input, shape index: {}]   ;;  %s4247_s2 = inlined_call_operand.vmem [shape: f32[8,2,2], index: 2, kind: input, shape index: {}]   ;;  %s4248_s4 = inlined_call_operand.vmem [shape: f32[9,96], index: 4, kind: input, shape index: {}]   ;;  %s4249_s5 = inlined_call_operand.vmem [shape: f32[32,96], index: 5, kind: input, shape index: {}]   ;;  %s4250_s0 = inlined_call_operand.vmem [shape: f32[8,2,4], index: 0, kind: input, shape index: {}]   ;;  %s4251_s7 = inlined_call_operand.vmem [shape: f32[1,32], index: 7, kind: input, shape index: {}]   ;;  %s4252_s6 = inlined_call_operand.vmem [shape: f32[1,96], index: 6, kind: input, shape index: {}]   ;;  %s4253_s8 = inlined_call_operand.vmem [shape: f32[3,96], index: 8, kind: input, shape index: {}]   ;;  %s4254_s9 = inlined_call_operand.vmem [shape: f32[32,96], index: 9, kind: input, shape index: {}]   ;;  %s4255_s3 = inlined_call_operand.vmem [shape: f32[8,2,3], index: 3, kind: input, shape index: {}]   ;;  %s4256_s11 = inlined_call_operand.vmem [shape: f32[1,32], index: 11, kind: input, shape index: {}]   ;;  %s4257_s10 = inlined_call_operand.vmem [shape: f32[1,96], index: 10, kind: input, shape index: {}]   ;;  %s4258_s15 = inlined_call_operand.vmem [shape: f32[8,2,32], index: 15, kind: output, shape index: {1}]   ;;  %s4259_s12 = inlined_call_operand.vmem [shape: f32[32,2], index: 12, kind: input, shape index: {}]   ;;  %s4260_s13 = inlined_call_operand.vmem [shape: f32[1,2], index: 13, kind: input, shape index: {}]   ;;  %s4261_s14 = inlined_call_operand.vmem [shape: f32[8,2,2], index: 14, kind: output, shape index: {0}]  }
   0x1   :  { %v57_v0 = vld [vmem:[%s4246_s1] sm:$0x3]  ;;  %v58_v1 = vld [vmem:[%s4246_s1 + $0x2] sm:$0x3]  ;;  %v59_v2 = vld [vmem:[%s4246_s1 + $0x4] sm:$0x3] }
   0x2   :  { %v60_v3 = vld [vmem:[%s4246_s1 + $0x6] sm:$0x3]  ;;  %v142_v4 = vsel %vm141_vm0, %v57_v0, 0.0  ;;  %v143_v5 = vsel %vm141_vm0, %v58_v1, 0.0  ;;  %v61_v6 = vld [vmem:[%s4246_s1 + $0x8] sm:$0x3]  ;;  %vm3163_vm6 = vmpackc.low %vm447_vm4, %vm3387_vm5 }
   0x3   :  { %v144_v7 = vadd.f32 %v143_v5, %v142_v4  ;;  %v145_v8 = vsel %vm141_vm0, %v59_v2, 0.0  ;;  %v3495_v9 = vld [vmem:[%s4247_s2] sm:$0x3]  ;;  %v147_v10 = vsel %vm141_vm0, %v60_v3, 0.0  ;;  %v3501_v11 = vld [vmem:[%s4247_s2 + $0x2] sm:$0x3] }
   0x4   :  { %v62_v12 = vld [vmem:[%s4246_s1 + $0xa] sm:$0x3]  ;;  %v67_v14 = vld [vmem:[%s4247_s2 + $0x4] sm:$0x3]  ;;  %v217_v15 = vsel %vm216_vm1, %v3495_v9, 0.0  ;;  %v149_v16 = vsel %vm141_vm0, %v61_v6, 0.0 }
   0x5   :  { %v146_v13 = vadd.f32 %v145_v8, %v144_v7  ;;  %v68_v17 = vld [vmem:[%s4247_s2 + $0x6] sm:$0x3]  ;;  %v63_v18 = vld [vmem:[%s4246_s1 + $0xc] sm:$0x3]  ;;  %v218_v20 = vsel %vm216_vm1, %v3501_v11, 0.0  ;;  %v220_v21 = vsel %vm216_vm1, %v67_v14, 0.0 }
   0x6   :  { %v151_v22 = vsel %vm141_vm0, %v62_v12, 0.0  ;;  %v69_v23 = vld [vmem:[%s4247_s2 + $0x8] sm:$0x3]  ;;  %v219_v24 = vadd.f32 %v218_v20, %v217_v15  ;;  %v64_v25 = vld [vmem:[%s4246_s1 + $0xe] sm:$0x3]  ;;  %v222_v27 = vsel %vm216_vm1, %v68_v17, 0.0 }
   0x7   :  { %v148_v19 = vadd.f32 %v147_v10, %v146_v13  ;;  %v153_v28 = vsel %vm141_vm0, %v63_v18, 0.0  ;;  %v70_v29 = vld [vmem:[%s4247_s2 + $0xa] sm:$0x3]  ;;  %v224_v32 = vsel %vm216_vm1, %v69_v23, 0.0  ;;  %v155_v33 = vsel %vm141_vm0, %v64_v25, 0.0 }
   0x8   :  { %v221_v30 = vadd.f32 %v220_v21, %v219_v24  ;;  %v226_v36 = vsel %vm216_vm1, %v70_v29, 0.0  ;;  %v71_v37 = vld [vmem:[%s4247_s2 + $0xc] sm:$0x3]  ;;  %v72_v47 = vld [vmem:[%s4247_s2 + $0xe] sm:$0x3]  ;;  %s3385_s2 = smov 4  }
   0x9   :  { %v150_v26 = vadd.f32 %v149_v16, %v148_v19  ;;  %v228_v42 = vsel %vm216_vm1, %v71_v37, 0.0  ;;  %v230_v56 = vsel %vm216_vm1, %v72_v47, 0.0  ;;  %vm81_vm7 = vcmask 25600  }
   0xa   :  { %v223_v34 = vadd.f32 %v222_v27, %v221_v30  ;;  %vm3389_vm8 = vmmov 0   ;;  %vm376_vm9 = vcmask 31744   ;;  %vm385_vm10 = vcmask 56320  }
   0xb   :  { %v152_v31 = vadd.f32 %v151_v22, %v150_v26  ;;  %vm442_vm11 = vcmask 72704   ;;  %vm570_vm12 = vcmask 261120   ;;  %vm1546_vm13 = vcmask 1042432  }
   0xc   :  { %v225_v38 = vadd.f32 %v224_v32, %v223_v34  ;;  %vm1541_vm14 = vcmask 23552   ;;  %vm2618_vm15 = vcmask 254976  }
   0xd   :  { %v154_v35 = vadd.f32 %v153_v28, %v152_v31 }
   0xe   :  { %v227_v40 = vadd.f32 %v226_v36, %v225_v38 }
   0xf   :  { %v156_v39 = vadd.f32 %v155_v33, %v154_v35 }
  0x10   :  { %v229_v50 = vadd.f32 %v228_v42, %v227_v40 }
  0x11   :  { %v3539_v41 = vmul.f32 0.125, %v156_v39 }
  0x13   :  { %v3543_v43 = vsub.f32 %v57_v0, %v3539_v41  ;;  %v3546_v44 = vsub.f32 %v58_v1, %v3539_v41  ;;  %v3549_v45 = vsub.f32 %v59_v2, %v3539_v41  ;;  %v3552_v46 = vsub.f32 %v60_v3, %v3539_v41 }
  0x14   :  { %v3558_v48 = vsub.f32 %v61_v6, %v3539_v41  ;;  %v3561_v49 = vsub.f32 %v62_v12, %v3539_v41  ;;  %v3572_v55 = vsub.f32 %v63_v18, %v3539_v41  ;;  %v3581_v61 = vsub.f32 %v64_v25, %v3539_v41 }
  0x15   :  { %v166_v51 = vmul.f32 %v3543_v43, %v3543_v43  ;;  %v167_v52 = vmul.f32 %v3546_v44, %v3546_v44  ;;  %v168_v53 = vmul.f32 %v3549_v45, %v3549_v45  ;;  %v169_v54 = vmul.f32 %v3552_v46, %v3552_v46 }
  0x16   :  { %v170_v57 = vmul.f32 %v3558_v48, %v3558_v48  ;;  %v171_v62 = vmul.f32 %v3561_v49, %v3561_v49  ;;  %v231_v1 = vadd.f32 %v230_v56, %v229_v50  ;;  %v172_v2 = vmul.f32 %v3572_v55, %v3572_v55 }
  0x17   :  { %v174_v58 = vsel %vm141_vm0, %v166_v51, 0.0  ;;  %v175_v59 = vsel %vm141_vm0, %v167_v52, 0.0  ;;  %v177_v60 = vsel %vm141_vm0, %v168_v53, 0.0  ;;  %v179_v0 = vsel %vm141_vm0, %v169_v54, 0.0 }
  0x18   :  { %v176_v63 = vadd.f32 %v175_v59, %v174_v58  ;;  %v181_v4 = vsel %vm141_vm0, %v170_v57, 0.0  ;;  %v3589_v5 = vmul.f32 0.125, %v231_v1  ;;  %v173_v6 = vmul.f32 %v3581_v61, %v3581_v61 }
  0x19   :  { %v183_v8 = vsel %vm141_vm0, %v171_v62, 0.0  ;;  %v185_v18 = vsel %vm141_vm0, %v172_v2, 0.0 }
  0x1a   :  { %v178_v3 = vadd.f32 %v177_v60, %v176_v63  ;;  %v3596_v10 = vsub.f32 %v3495_v9, %v3589_v5  ;;  %v3600_v12 = vsub.f32 %v3501_v11, %v3589_v5  ;;  %v3603_v13 = vsub.f32 %v67_v14, %v3589_v5 }
  0x1b   :  { %v3606_v15 = vsub.f32 %v68_v17, %v3589_v5  ;;  %v3610_v19 = vsub.f32 %v69_v23, %v3589_v5  ;;  %v3613_v20 = vsub.f32 %v70_v29, %v3589_v5  ;;  %v187_v21 = vsel %vm141_vm0, %v173_v6, 0.0 }
  0x1c   :  { %v180_v7 = vadd.f32 %v179_v0, %v178_v3  ;;  %v241_v9 = vmul.f32 %v3596_v10, %v3596_v10  ;;  %v242_v11 = vmul.f32 %v3600_v12, %v3600_v12  ;;  %v243_v14 = vmul.f32 %v3603_v13, %v3603_v13 }
  0x1d   :  { %v244_v22 = vmul.f32 %v3606_v15, %v3606_v15  ;;  %v3625_v23 = vsub.f32 %v71_v37, %v3589_v5  ;;  %v245_v24 = vmul.f32 %v3610_v19, %v3610_v19  ;;  %v3633_v30 = vsub.f32 %v72_v47, %v3589_v5 }
  0x1e   :  { %v182_v16 = vadd.f32 %v181_v4, %v180_v7  ;;  %v249_v25 = vsel %vm216_vm1, %v241_v9, 0.0  ;;  %v250_v26 = vsel %vm216_vm1, %v242_v11, 0.0  ;;  %v252_v29 = vsel %vm216_vm1, %v243_v14, 0.0  ;;  %v286_v11 = vld [vmem:[%s4249_s5 + $0x10] sm:$0xff]  ;;  %v287_v14 = vld [vmem:[%s4249_s5 + $0x18] sm:$0xff] }
  0x1f   :  { %v251_v28 = vadd.f32 %v250_v26, %v249_v25  ;;  %v246_v31 = vmul.f32 %v3613_v20, %v3613_v20  ;;  %v254_v32 = vsel %vm216_vm1, %v244_v22, 0.0  ;;  %v247_v35 = vmul.f32 %v3625_v23, %v3625_v23  ;;  %v50_v22 = vld [vmem:[%s4250_s0 + $0x2] sm:$0x3]  ;;  %v2826_v26 = vld [vmem:[%s4251_s7] ss:$0 sm:$0xff] }
  0x20   :  { %v184_v17 = vadd.f32 %v183_v8, %v182_v16  ;;  %v256_v36 = vsel %vm216_vm1, %v245_v24, 0.0  ;;  %v248_v39 = vmul.f32 %v3633_v30, %v3633_v30  ;;  %v285_v16 = vld [vmem:[%s4249_s5 + $0x8] sm:$0xff]  ;;  %v3388_v9 = vmov 0.0|0.0  }
  0x21   :  { %v253_v34 = vadd.f32 %v252_v29, %v251_v28  ;;  %v258_v40 = vsel %vm216_vm1, %v246_v31, 0.0  ;;  %v260_v50 = vsel %vm216_vm1, %v247_v35, 0.0  ;;  %3174 = vmatprep.subr.bf16.mxu0 %v3388_v9  ;;  %v83_v25 = vsel %vm81_vm7, %v50_v22, 0.0 }
  0x22   :  { %v186_v27 = vadd.f32 %v185_v18, %v184_v17  ;;  %v262_v52 = vsel %vm216_vm1, %v248_v39, 0.0  ;;  %v3705_v17 = vpack.c.bf16 %v287_v14, %v286_v11  ;;  %v55_v39 = vld [vmem:[%s4250_s0 + $0xc] sm:$0x3] }
  0x23   :  { %v255_v38 = vadd.f32 %v254_v32, %v253_v34 }
  0x24   :  { %v188_v33 = vadd.f32 %v187_v21, %v186_v27  ;;  %v49_v21 = vld [vmem:[%s4250_s0] sm:$0x3]  ;;  %v51_v27 = vld [vmem:[%s4250_s0 + $0x4] sm:$0x3] }
  0x25   :  { %v257_v47 = vadd.f32 %v256_v36, %v255_v38  ;;  %v82_v24 = vsel %vm81_vm7, %v49_v21, 0.0  ;;  %v85_v29 = vsel %vm81_vm7, %v51_v27, 0.0  ;;  %v54_v36 = vld [vmem:[%s4250_s0 + $0xa] sm:$0x3] }
  0x26   :  { %v189_v37 = vmul.f32 0.125, %v188_v33  ;;  %v84_v28 = vadd.f32 %v83_v25, %v82_v24  ;;  %v53_v33 = vld [vmem:[%s4250_s0 + $0x8] sm:$0x3]  ;;  %v91_v38 = vsel %vm81_vm7, %v54_v36, 0.0 }
  0x27   :  { %v259_v51 = vadd.f32 %v258_v40, %v257_v47  ;;  %v89_v35 = vsel %vm81_vm7, %v53_v33, 0.0  ;;  %v56_v47 = vld [vmem:[%s4250_s0 + $0xe] sm:$0x3] }
  0x28   :  { %v190_v42 = vadd.f32 1e-05, %v189_v37  ;;  %v86_v31 = vadd.f32 %v85_v29, %v84_v28 }
  0x29   :  { %v261_v53 = vadd.f32 %v260_v50, %v259_v51  ;;  %v95_v51 = vsel %vm81_vm7, %v56_v47, 0.0 }
  0x2a   :  { %3281 = vrsqrt.f32 %v190_v42  ;;  %v93_v42 = vsel %vm81_vm7, %v55_v39, 0.0 }
  0x2b   :  { %v263_v54 = vadd.f32 %v262_v52, %v261_v53 }
  0x2d   :  { %v264_v56 = vmul.f32 0.125, %v263_v54 }
  0x2f   :  { %v265_v57 = vadd.f32 1e-05, %v264_v56 }
  0x31   :  { %3283 = vrsqrt.f32 %v265_v57  ;;  %vm268_vm2 = vcmp.eq.f32.partialorder %v265_v57, inf  ;;  %vm270_vm3 = vcmp.eq.f32.partialorder %v265_v57, 0.0 }
  0x34   :  { %v3646_v58 = vpop.eup %3281 }
  0x35   :  { %v194_v59 = vmul.f32 %v3646_v58, %v3549_v45  ;;  %v192_v60 = vmul.f32 %v3646_v58, %v3543_v43  ;;  %v195_v62 = vmul.f32 %v3646_v58, %v3552_v46  ;;  %v193_v63 = vmul.f32 %v3646_v58, %v3546_v44 }
  0x36   :  { %v197_v0 = vmul.f32 %v3646_v58, %v3561_v49  ;;  %v196_v45 = vmul.f32 %v3646_v58, %v3558_v48  ;;  %v271_v43 = vand.u32 2147483648, %v265_v57  ;;  %v199_v2 = vmul.f32 %v3646_v58, %v3581_v61  ;;  %v282_v61 = vld [vmem:[%s4248_s4] sm:$0xff] }
  0x37   :  { %324 = vrot.lane.b32.xlu1 %v194_v59, %s3385_s2  ;;  %320 = vrot.lane.b32.xlu0 %v192_v60, %s3385_s2  ;;  %v198_v46 = vmul.f32 %v3646_v58, %v3572_v55  ;;  %v283_v55 = vld [vmem:[%s4248_s4 + $0x8] sm:$0x1] }
  0x3b   :  { %326 = vrot.lane.b32.xlu1 %v195_v62, %s3385_s2  ;;  %322 = vrot.lane.b32.xlu0 %v193_v63, %s3385_s2  ;;  %v3284_v1 = vpop.eup %3283 }
  0x3c   :  { %v267_v44 = vmul.f32 %v3284_v1, %v265_v57 }
  0x3e   :  { %v269_v3 = vsel %vm268_vm2, %v265_v57, %v267_v44 }
  0x3f   :  { %330 = vrot.lane.b32.xlu1 %v197_v0, %s3385_s2  ;;  %328 = vrot.lane.b32.xlu0 %v196_v45, %s3385_s2  ;;  %v3664_v4 = vsel %vm270_vm3, %v271_v43, %v269_v3 }
  0x40   :  { %3285 = vrcp.f32 %v3664_v4 }
  0x43   :  { %334 = vrot.lane.b32.xlu1 %v199_v2, %s3385_s2  ;;  %332 = vrot.lane.b32.xlu0 %v198_v46, %s3385_s2 }
  0x4a   :  { %v3286_v48 = vpop.eup %3285 }
  0x4b   :  { %v275_v49 = vmul.f32 %v3286_v48, %v3600_v12  ;;  %v274_v6 = vmul.f32 %v3286_v48, %v3596_v10  ;;  %v277_v7 = vmul.f32 %v3286_v48, %v3606_v15  ;;  %v276_v8 = vmul.f32 %v3286_v48, %v3603_v13  ;;  %v284_v10 = vld [vmem:[%s4249_s5] sm:$0xff] }
  0x4c   :  { %v3162_v12 = vpack.c.bf16 %v283_v55, %v282_v61  ;;  %v279_v15 = vmul.f32 %v3286_v48, %v3613_v20  ;;  %v278_v13 = vmul.f32 %v3286_v48, %v3610_v19  ;;  %v3689_v18 = vpack.c.bf16 %v285_v16, %v284_v10 }
  0x4d   :  { %354 = vrot.lane.b32.xlu1 %v275_v49, %s3386_s23  ;;  %352 = vrot.lane.b32.xlu0 %v274_v6, %s3386_s23  ;;  %v281_v20 = vmul.f32 %v3286_v48, %v3633_v30  ;;  %v280_v19 = vmul.f32 %v3286_v48, %v3625_v23  ;;  %v3390_v23 = vmov 0.0   ;;  %v52_v30 = vld [vmem:[%s4250_s0 + $0x6] sm:$0x3] }
  0x4e   :  { %3164 = vmatprep.subr.msk.bf16.mxu1 %vm3163_vm6, %v3162_v12  ;;  %3176 = vmatpush3.bf16.msra.mxu0 %v3689_v18  ;;  %v87_v32 = vsel %vm81_vm7, %v52_v30, 0.0 }
  0x4f   :  { %3167 = vmatpush3.bf16.msk.msra.mxu1 %vm3163_vm6, %v3162_v12  ;;  %3177 = vmatprep.subr.bf16.mxu0 %v3388_v9  ;;  %v88_v34 = vadd.f32 %v87_v32, %v86_v31 }
  0x50   :  { %3168 = vmatprep.subr.bf16.mxu1 %v3388_v9  ;;  %2989 = vmatprep.mubr.msk.f32.mxu0 %vm3389_vm8, %v3390_v23 }
  0x51   :  { %358 = vrot.lane.b32.xlu1 %v277_v7, %s3386_s23  ;;  %356 = vrot.lane.b32.xlu0 %v276_v8, %s3386_s23  ;;  %v90_v37 = vadd.f32 %v89_v35, %v88_v34  ;;  %v413_v35 = vlaneseq }
  0x52   :  { %3179 = vmatpush3.bf16.msra.mxu0 %v3705_v17 }
  0x53   :  { %3186 = vmatprep.subr.bf16.mxu0 %v3388_v9  ;;  %v92_v40 = vadd.f32 %v91_v38, %v90_v37 }
  0x55   :  { %362 = vrot.lane.b32.xlu1 %v279_v15, %s3386_s23  ;;  %360 = vrot.lane.b32.xlu0 %v278_v13, %s3386_s23  ;;  %v94_v50 = vadd.f32 %v93_v42, %v92_v40 }
  0x57   :  { %v96_v52 = vadd.f32 %v95_v51, %v94_v50 }
  0x59   :  { %366 = vrot.lane.b32.xlu1 %v281_v20, %s3386_s23  ;;  %364 = vrot.lane.b32.xlu0 %v280_v19, %s3386_s23  ;;  %v98_v53 = vmul.f32 0.125, %v96_v52 }
  0x5b   :  { %v99_v54 = vsub.f32 %v49_v21, %v98_v53  ;;  %v100_v56 = vsub.f32 %v50_v22, %v98_v53  ;;  %v101_v57 = vsub.f32 %v51_v27, %v98_v53  ;;  %v102_v62 = vsub.f32 %v52_v30, %v98_v53 }
  0x5c   :  { %v103_v43 = vsub.f32 %v53_v33, %v98_v53  ;;  %v104_v3 = vsub.f32 %v54_v36, %v98_v53  ;;  %v105_v61 = vsub.f32 %v55_v39, %v98_v53  ;;  %v106_v12 = vsub.f32 %v56_v47, %v98_v53 }
  0x5d   :  { %651 = vrot.lane.b32.xlu0 %v2826_v26, %s3391_s21  ;;  %v107_v59 = vmul.f32 %v99_v54, %v99_v54  ;;  %v108_v60 = vmul.f32 %v100_v56, %v100_v56  ;;  %v109_v63 = vmul.f32 %v101_v57, %v101_v57  ;;  %v110_v2 = vmul.f32 %v102_v62, %v102_v62 }
  0x5e   :  { %v111_v48 = vmul.f32 %v103_v43, %v103_v43  ;;  %v112_v55 = vmul.f32 %v104_v3, %v104_v3  ;;  %v113_v10 = vmul.f32 %v105_v61, %v105_v61  ;;  %v114_v13 = vmul.f32 %v106_v12, %v106_v12 }
  0x5f   :  { %v115_v0 = vsel %vm81_vm7, %v107_v59, 0.0  ;;  %v116_v45 = vsel %vm81_vm7, %v108_v60, 0.0  ;;  %v118_v46 = vsel %vm81_vm7, %v109_v63, 0.0  ;;  %v120_v49 = vsel %vm81_vm7, %v110_v2, 0.0 }
  0x60   :  { %v117_v1 = vadd.f32 %v116_v45, %v115_v0  ;;  %v122_v7 = vsel %vm81_vm7, %v111_v48, 0.0  ;;  %v124_v16 = vsel %vm81_vm7, %v112_v55, 0.0  ;;  %v126_v20 = vsel %vm81_vm7, %v113_v10, 0.0 }
  0x61   :  { %v128_v11 = vsel %vm81_vm7, %v114_v13, 0.0  ;;  %v3392_v33 = vmov 1983009808   ;;  %v414_v39 = vshrl.u32 %v413_v35, 7 }
  0x62   :  { %v119_v44 = vadd.f32 %v118_v46, %v117_v1  ;;  %v411_v34 = vunpack.c.l.s4 %v3392_v33 }
  0x64   :  { %v121_v6 = vadd.f32 %v120_v49, %v119_v44  ;;  %v412_v38 = vunpack.c.0.s8 %v411_v34 }
  0x66   :  { %v123_v8 = vadd.f32 %v122_v7, %v121_v6  ;;  %v3761_v63 = vsub.s32 %v412_v38, %v414_v39 }
  0x68   :  { %v125_v15 = vadd.f32 %v124_v16, %v123_v8 }
  0x6a   :  { %v127_v19 = vadd.f32 %v126_v20, %v125_v15 }
  0x6c   :  { %v129_v14 = vadd.f32 %v128_v11, %v127_v19 }
  0x6e   :  { %v130_v21 = vmul.f32 0.125, %v129_v14 }
  0x70   :  { %v131_v25 = vadd.f32 1e-05, %v130_v21 }
  0x72   :  { %3287 = vrsqrt.f32 %v131_v25  ;;  %v2828_v25 = vld [vmem:[%s4252_s6] ss:$0 sm:$0xff]  ;;  %s3393_s6 = smov 96  }
  0x7c   :  { %v3288_v30 = vpop.eup %3287 }
  0x7d   :  { %v133_v36 = vmul.f32 %v3288_v30, %v99_v54  ;;  %v134_v37 = vmul.f32 %v3288_v30, %v100_v56  ;;  %v135_v40 = vmul.f32 %v3288_v30, %v101_v57  ;;  %v136_v47 = vmul.f32 %v3288_v30, %v102_v62 }
  0x7e   :  { %v138_v60 = vmul.f32 %v3288_v30, %v104_v3  ;;  %v137_v0 = vmul.f32 %v3288_v30, %v103_v43  ;;  %v140_v44 = vmul.f32 %v3288_v30, %v106_v12  ;;  %v139_v48 = vmul.f32 %v3288_v30, %v105_v61 }
  0xa9   :  { %v325_v22 = vpop.permute.xlu1 %324  ;;  %v321_v24 = vpop.permute.xlu0 %320 }
  0xaa   :  { %v377_v42 = vsel %vm376_vm9, %v133_v36, %v321_v24  ;;  %v379_v54 = vsel %vm376_vm9, %v135_v40, %v325_v22 }
  0xad   :  { %v327_v26 = vpop.permute.xlu1 %326  ;;  %v323_v27 = vpop.permute.xlu0 %322 }
  0xae   :  { %v378_v50 = vsel %vm376_vm9, %v134_v37, %v323_v27  ;;  %v380_v56 = vsel %vm376_vm9, %v136_v47, %v327_v26 }
  0xb1   :  { %v331_v28 = vpop.permute.xlu1 %330  ;;  %v329_v29 = vpop.permute.xlu0 %328 }
  0xb2   :  { %v382_v49 = vsel %vm376_vm9, %v138_v60, %v331_v28  ;;  %v381_v3 = vsel %vm376_vm9, %v137_v0, %v329_v29 }
  0xb5   :  { %v335_v31 = vpop.permute.xlu1 %334  ;;  %v333_v32 = vpop.permute.xlu0 %332 }
  0xb6   :  { %v384_v15 = vsel %vm376_vm9, %v140_v44, %v335_v31  ;;  %v383_v61 = vsel %vm376_vm9, %v139_v48, %v333_v32 }
  0xbf   :  { %v355_v51 = vpop.permute.xlu1 %354  ;;  %v353_v52 = vpop.permute.xlu0 %352 }
  0xc0   :  { %v387_v53 = vsel %vm385_vm10, %v378_v50, %v355_v51  ;;  %v386_v59 = vsel %vm385_vm10, %v377_v42, %v353_v52 }
  0xc1   :  { %v408_v57 = vcombine.low %v386_v59, %v387_v53 }
  0xc3   :  { %v359_v45 = vpop.permute.xlu1 %358  ;;  %v357_v1 = vpop.permute.xlu0 %356  ;;  %v416_v7 = vrot.slane %v408_v57, %v3761_v63 }
  0xc4   :  { %v389_v62 = vsel %vm385_vm10, %v380_v56, %v359_v45  ;;  %v388_v2 = vsel %vm385_vm10, %v379_v54, %v357_v1 }
  0xc5   :  { %v409_v46 = vcombine.low %v388_v2, %v389_v62 }
  0xc7   :  { %v363_v6 = vpop.permute.xlu1 %362  ;;  %v361_v55 = vpop.permute.xlu0 %360  ;;  %v423_v43 = vrot.slane %v409_v46, %v3761_v63 }
  0xc8   :  { %v391_v8 = vsel %vm385_vm10, %v382_v49, %v363_v6  ;;  %v390_v10 = vsel %vm385_vm10, %v381_v3, %v361_v55 }
  0xc9   :  { %v424_v16 = vcombine.low %v416_v7, %v423_v43  ;;  %v425_v12 = vcombine.low %v390_v10, %v391_v8 }
  0xcb   :  { %v367_v13 = vpop.permute.xlu1 %366  ;;  %v365_v20 = vpop.permute.xlu0 %364  ;;  %2967 = vmatprep.mubr.msk.f32.mxu1 %vm442_vm11, %v424_v16  ;;  %v433_v21 = vrot.slane %v425_v12, %v3761_v63 }
  0xcc   :  { %v393_v19 = vsel %vm385_vm10, %v384_v15, %v367_v13  ;;  %v392_v11 = vsel %vm385_vm10, %v383_v61, %v365_v20 }
  0xcd   :  { %v426_v14 = vcombine.low %v392_v11, %v393_v19 }
  0xcf   :  { %v440_v22 = vrot.slane %v426_v14, %v3761_v63  ;;  %v3797_v29 = vpop.permute.xlu0 %651 }
  0xd1   :  { %v441_v24 = vcombine.low %v433_v21, %v440_v22 }
  0xd3   :  { %2968 = vmatmul.mubr.msk.f32.vlgmr.msra.gmra.mrb[0].mxu1 %vm442_vm11, %v441_v24 }
  0xd4   :  { %3170 = vmatpush3.bf16.msra.mxu1 %v3689_v18  ;;  %2978 = vmatprep.mubr.msk.f32.mxu1 %vm3389_vm8, %v3390_v23 }
  0xd5   :  { %3171 = vmatprep.subr.bf16.mxu1 %v3388_v9 }
  0xd8   :  { %3173 = vmatpush3.bf16.msra.mxu1 %v3705_v17 }
  0xd9   :  { %3180 = vmatprep.subr.bf16.mxu1 %v3388_v9 }
  0xdb   :  { %2979 = vmatmul.mubr.f32.vlgmr.msra.gmra.mrb[2].mxu1 %v3390_v23 }
  0xdc   :  { %3182 = vmatpush3.bf16.msra.mxu1 %v3689_v18  ;;  %3000 = vmatprep.mubr.msk.f32.mxu1 %vm3389_vm8, %v3390_v23 }
  0xdd   :  { %3183 = vmatprep.subr.bf16.mxu1 %v3388_v9 }
  0xe0   :  { %3185 = vmatpush3.bf16.msra.mxu1 %v3705_v17 }
  0xe1   :  { %3192 = vmatprep.subr.bf16.mxu1 %v3388_v9 }
 0x1a6   :  { %v2969_v26 = vpop.f32.mrb[0].mxu1 }
 0x1a7   :  { %v3795_v27 = vadd.f32 %v2969_v26, %v2828_v25  ;;  %v517_v28 = vpop.f32.mrb[1].mxu1 }
 0x1a8   :  { %v3802_v34 = vadd.f32 %v2828_v25, %v517_v28 }
 0x1aa   :  { %v535_v35 = vrot.slane %v3802_v34, %v3761_v63  ;;  %v528_v24 = vcombine.high %v3802_v34, %v3802_v34 }
 0x1ac   :  { %v543_v46 = vcombine.high %v535_v35, %v535_v35  ;;  %v542_v25 = vrot.slane %v528_v24, %v3761_v63 }
 0x1ae   :  { %v640_v30 = vpop.f32.mrb[2].mxu1 }
 0x1af   :  { %v654_v31 = vadd.f32 %v3797_v29, %v640_v30  ;;  %v2980_v32 = vpop.f32.mrb[3].mxu1  ;;  %v644_v36 = vadd.f32 %v640_v30, %v535_v35 }
 0x1b1   :  { %v662_v33 = vrot.slane %v654_v31, %v3761_v63  ;;  %v2832_v37 = vmul.f32 -1.442695, %v644_v36 }
 0x1b3   :  { %663 = vrot.lane.b32.xlu1 %v662_v33, %s3391_s21  ;;  %3289 = vpow2.f32 %v2832_v37 }
 0x1bd   :  { %v3290_v38 = vpop.eup %3289 }
 0x1be   :  { %v648_v39 = vadd.f32 1.0, %v3290_v38 }
 0x1c0   :  { %3291 = vrcp.f32 %v648_v39 }
 0x1ca   :  { %v3292_v40 = vpop.eup %3291 }
 0x1cb   :  { %v673_v53 = vsub.f32 1.0, %v3292_v40  ;;  %v679_v60 = vmul.f32 0.0, %v3292_v40 }
 0x225   :  { %v664_v42 = vpop.permute.xlu1 %663 }
 0x226   :  { %v666_v47 = vmul.f32 %v3292_v40, %v664_v42 }
 0x228   :  { %668 = vrot.lane.b32.xlu0 %v666_v47, %s3391_s21 }
 0x29a   :  { %v669_v50 = vpop.permute.xlu0 %668 }
 0x29b   :  { %v671_v51 = vadd.f32 %v669_v50, %v535_v35 }
 0x29d   :  { %3293 = vtanh.f32 %v671_v51 }
 0x2a7   :  { %v3294_v52 = vpop.eup %3293 }
 0x2a8   :  { %675 = vrot.lane.b32.xlu1 %v3294_v52, %s3393_s6 }
 0x31a   :  { %v676_v59 = vpop.permute.xlu1 %675 }
 0x31b   :  { %v678_v54 = vmul.f32 %v676_v59, %v673_v53 }
 0x31d   :  { %v680_v56 = vadd.f32 %v679_v60, %v678_v54  ;;  %v544_v54 = vcombine.high %v542_v25, %v542_v25 }
 0x31f   :  { %v688_v0 = vrot.slane %v680_v56, %v3761_v63 }
 0x321   :  { %689 = vrot.lane.b32.xlu0 %v688_v0, %s3393_s6 }
 0x393   :  { %v690_v57 = vpop.permute.xlu0 %689 }
 0x394   :  { %2990 = vmatmul.mubr.msk.f32.vlgmr.msra.gmra.mrb[0].mxu0 %vm570_vm12, %v690_v57 }
 0x395   :  { %3188 = vmatpush3.bf16.msra.mxu0 %v3689_v18  ;;  %3011 = vmatprep.mubr.msk.f32.mxu0 %vm3389_vm8, %v3390_v23 }
 0x396   :  { %3189 = vmatprep.subr.bf16.mxu0 %v3388_v9 }
 0x399   :  { %3191 = vmatpush3.bf16.msra.mxu0 %v3705_v17 }
 0x39a   :  { %3198 = vmatprep.subr.bf16.mxu0 %v3388_v9 }
 0x467   :  { %v759_v45 = vpop.f32.mrb[0].mxu0 }
 0x468   :  { %v770_v1 = vadd.f32 %v759_v45, %v3797_v29  ;;  %v2991_v62 = vpop.f32.mrb[1].mxu0  ;;  %v763_v44 = vadd.f32 %v759_v45, %v543_v46 }
 0x46a   :  { %v778_v2 = vrot.slane %v770_v1, %v3761_v63  ;;  %v2834_v48 = vmul.f32 -1.442695, %v763_v44 }
 0x46c   :  { %779 = vrot.lane.b32.xlu1 %v778_v2, %s3391_s21  ;;  %3295 = vpow2.f32 %v2834_v48 }
 0x476   :  { %v3296_v49 = vpop.eup %3295 }
 0x477   :  { %v767_v3 = vadd.f32 1.0, %v3296_v49 }
 0x479   :  { %3297 = vrcp.f32 %v767_v3 }
 0x483   :  { %v3298_v6 = vpop.eup %3297 }
 0x484   :  { %v789_v16 = vsub.f32 1.0, %v3298_v6  ;;  %v795_v61 = vmul.f32 %v3298_v6, %v680_v56 }
 0x4de   :  { %v780_v55 = vpop.permute.xlu1 %779 }
 0x4df   :  { %v782_v7 = vmul.f32 %v3298_v6, %v780_v55 }
 0x4e1   :  { %784 = vrot.lane.b32.xlu0 %v782_v7, %s3391_s21 }
 0x553   :  { %v785_v43 = vpop.permute.xlu0 %784 }
 0x554   :  { %v787_v8 = vadd.f32 %v785_v43, %v543_v46 }
 0x556   :  { %3299 = vtanh.f32 %v787_v8 }
 0x560   :  { %v3300_v10 = vpop.eup %3299 }
 0x561   :  { %791 = vrot.lane.b32.xlu1 %v3300_v10, %s3393_s6 }
 0x5d3   :  { %v792_v15 = vpop.permute.xlu1 %791 }
 0x5d4   :  { %v794_v12 = vmul.f32 %v792_v15, %v789_v16 }
 0x5d6   :  { %v796_v13 = vadd.f32 %v795_v61, %v794_v12  ;;  %v552_v12 = vrot.slane %v3795_v27, %v3761_v63 }
 0x5d8   :  { %v804_v20 = vrot.slane %v796_v13, %v3761_v63 }
 0x5da   :  { %805 = vrot.lane.b32.xlu0 %v804_v20, %s3393_s6 }
 0x64c   :  { %v806_v19 = vpop.permute.xlu0 %805 }
 0x64d   :  { %3001 = vmatmul.mubr.msk.f32.vlgmr.msra.gmra.mrb[4].mxu1 %vm570_vm12, %v806_v19 }
 0x64e   :  { %3194 = vmatpush3.bf16.msra.mxu1 %v3689_v18  ;;  %3022 = vmatprep.mubr.msk.f32.mxu1 %vm3389_vm8, %v3390_v23 }
 0x64f   :  { %3195 = vmatprep.subr.bf16.mxu1 %v3388_v9 }
 0x652   :  { %3197 = vmatpush3.bf16.msra.mxu1 %v3705_v17 }
 0x653   :  { %3204 = vmatprep.subr.bf16.mxu1 %v3388_v9 }
 0x720   :  { %v875_v11 = vpop.f32.mrb[4].mxu1 }
 0x721   :  { %v886_v14 = vadd.f32 %v875_v11, %v3797_v29  ;;  %v3002_v21 = vpop.f32.mrb[5].mxu1  ;;  %v879_v26 = vadd.f32 %v875_v11, %v542_v25 }
 0x723   :  { %v894_v22 = vrot.slane %v886_v14, %v3761_v63  ;;  %v2836_v28 = vmul.f32 -1.442695, %v879_v26 }
 0x725   :  { %895 = vrot.lane.b32.xlu1 %v894_v22, %s3391_s21  ;;  %3301 = vpow2.f32 %v2836_v28 }
 0x72f   :  { %v3302_v30 = vpop.eup %3301 }
 0x730   :  { %v883_v31 = vadd.f32 1.0, %v3302_v30 }
 0x732   :  { %3303 = vrcp.f32 %v883_v31 }
 0x73c   :  { %v3304_v32 = vpop.eup %3303 }
 0x73d   :  { %v905_v34 = vsub.f32 1.0, %v3304_v32  ;;  %v911_v40 = vmul.f32 %v3304_v32, %v796_v13 }
 0x797   :  { %v896_v33 = vpop.permute.xlu1 %895 }
 0x798   :  { %v898_v35 = vmul.f32 %v3304_v32, %v896_v33 }
 0x79a   :  { %900 = vrot.lane.b32.xlu0 %v898_v35, %s3391_s21 }
 0x80c   :  { %v901_v36 = vpop.permute.xlu0 %900 }
 0x80d   :  { %v903_v37 = vadd.f32 %v901_v36, %v542_v25 }
 0x80f   :  { %3305 = vtanh.f32 %v903_v37 }
 0x819   :  { %v3306_v38 = vpop.eup %3305 }
 0x81a   :  { %907 = vrot.lane.b32.xlu1 %v3306_v38, %s3393_s6 }
 0x88c   :  { %v908_v39 = vpop.permute.xlu1 %907 }
 0x88d   :  { %v910_v42 = vmul.f32 %v908_v39, %v905_v34 }
 0x88f   :  { %v912_v47 = vadd.f32 %v911_v40, %v910_v42  ;;  %v560_v40 = vcombine.high %v552_v12, %v552_v12 }
 0x891   :  { %v920_v50 = vrot.slane %v912_v47, %v3761_v63 }
 0x893   :  { %921 = vrot.lane.b32.xlu0 %v920_v50, %s3393_s6 }
 0x905   :  { %v922_v51 = vpop.permute.xlu0 %921 }
 0x906   :  { %3012 = vmatmul.mubr.msk.f32.vlgmr.msra.gmra.mrb[2].mxu0 %vm570_vm12, %v922_v51 }
 0x907   :  { %3200 = vmatpush3.bf16.msra.mxu0 %v3689_v18  ;;  %3033 = vmatprep.mubr.msk.f32.mxu0 %vm3389_vm8, %v3390_v23 }
 0x908   :  { %3201 = vmatprep.subr.bf16.mxu0 %v3388_v9 }
 0x90b   :  { %3203 = vmatpush3.bf16.msra.mxu0 %v3705_v17 }
 0x90c   :  { %3210 = vmatprep.subr.bf16.mxu0 %v3388_v9 }
 0x9d9   :  { %v991_v52 = vpop.f32.mrb[2].mxu0 }
 0x9da   :  { %v1002_v53 = vadd.f32 %v991_v52, %v3797_v29  ;;  %v3013_v59 = vpop.f32.mrb[3].mxu0  ;;  %v995_v56 = vadd.f32 %v991_v52, %v544_v54 }
 0x9dc   :  { %v1010_v60 = vrot.slane %v1002_v53, %v3761_v63  ;;  %v2838_v0 = vmul.f32 -1.442695, %v995_v56 }
 0x9de   :  { %1011 = vrot.lane.b32.xlu1 %v1010_v60, %s3391_s21  ;;  %3307 = vpow2.f32 %v2838_v0 }
 0x9e8   :  { %v3308_v57 = vpop.eup %3307 }
 0x9e9   :  { %v999_v45 = vadd.f32 1.0, %v3308_v57 }
 0x9eb   :  { %3309 = vrcp.f32 %v999_v45 }
 0x9f5   :  { %v3310_v1 = vpop.eup %3309 }
 0x9f6   :  { %v1021_v49 = vsub.f32 1.0, %v3310_v1  ;;  %v1027_v6 = vmul.f32 %v3310_v1, %v912_v47 }
 0xa50   :  { %v1012_v62 = vpop.permute.xlu1 %1011 }
 0xa51   :  { %v1014_v2 = vmul.f32 %v3310_v1, %v1012_v62 }
 0xa53   :  { %1016 = vrot.lane.b32.xlu0 %v1014_v2, %s3391_s21 }
 0xac5   :  { %v1017_v46 = vpop.permute.xlu0 %1016 }
 0xac6   :  { %v1019_v44 = vadd.f32 %v1017_v46, %v544_v54 }
 0xac8   :  { %3311 = vtanh.f32 %v1019_v44 }
 0xad2   :  { %v3312_v48 = vpop.eup %3311 }
 0xad3   :  { %1023 = vrot.lane.b32.xlu1 %v3312_v48, %s3393_s6 }
 0xb45   :  { %v1024_v3 = vpop.permute.xlu1 %1023 }
 0xb46   :  { %v1026_v55 = vmul.f32 %v1024_v3, %v1021_v49  ;;  %v545_v49 = vcombine.high %v3795_v27, %v3795_v27 }
 0xb48   :  { %v1028_v7 = vadd.f32 %v1027_v6, %v1026_v55  ;;  %v559_v3 = vrot.slane %v545_v49, %v3761_v63 }
 0xb4a   :  { %v1036_v43 = vrot.slane %v1028_v7, %v3761_v63 }
 0xb4c   :  { %1037 = vrot.lane.b32.xlu0 %v1036_v43, %s3393_s6 }
 0xbbe   :  { %v1038_v8 = vpop.permute.xlu0 %1037 }
 0xbbf   :  { %3023 = vmatmul.mubr.msk.f32.vlgmr.msra.gmra.mrb[6].mxu1 %vm570_vm12, %v1038_v8 }
 0xbc0   :  { %3206 = vmatpush3.bf16.msra.mxu1 %v3689_v18  ;;  %3044 = vmatprep.mubr.msk.f32.mxu1 %vm3389_vm8, %v3390_v23 }
 0xbc1   :  { %3207 = vmatprep.subr.bf16.mxu1 %v3388_v9 }
 0xbc4   :  { %3209 = vmatpush3.bf16.msra.mxu1 %v3705_v17 }
 0xc92   :  { %v1107_v10 = vpop.f32.mrb[6].mxu1 }
 0xc93   :  { %v1118_v16 = vadd.f32 %v1107_v10, %v3797_v29  ;;  %v3024_v15 = vpop.f32.mrb[7].mxu1  ;;  %v1111_v13 = vadd.f32 %v1107_v10, %v552_v12 }
 0xc95   :  { %v1126_v61 = vrot.slane %v1118_v16, %v3761_v63  ;;  %v2840_v20 = vmul.f32 -1.442695, %v1111_v13 }
 0xc97   :  { %1127 = vrot.lane.b32.xlu1 %v1126_v61, %s3391_s21  ;;  %3313 = vpow2.f32 %v2840_v20 }
 0xca1   :  { %v3314_v19 = vpop.eup %3313 }
 0xca2   :  { %v1115_v11 = vadd.f32 1.0, %v3314_v19 }
 0xca4   :  { %3315 = vrcp.f32 %v1115_v11 }
 0xcae   :  { %v3316_v14 = vpop.eup %3315 }
 0xcaf   :  { %v1137_v28 = vsub.f32 1.0, %v3316_v14  ;;  %v1143_v31 = vmul.f32 %v3316_v14, %v1028_v7 }
 0xd09   :  { %v1128_v21 = vpop.permute.xlu1 %1127 }
 0xd0a   :  { %v1130_v22 = vmul.f32 %v3316_v14, %v1128_v21 }
 0xd0c   :  { %1132 = vrot.lane.b32.xlu0 %v1130_v22, %s3391_s21 }
 0xd7e   :  { %v1133_v24 = vpop.permute.xlu0 %1132 }
 0xd7f   :  { %v1135_v25 = vadd.f32 %v1133_v24, %v552_v12 }
 0xd81   :  { %3317 = vtanh.f32 %v1135_v25 }
 0xd8b   :  { %v3318_v26 = vpop.eup %3317 }
 0xd8c   :  { %1139 = vrot.lane.b32.xlu1 %v3318_v26, %s3393_s6 }
 0xdfe   :  { %v1140_v30 = vpop.permute.xlu1 %1139 }
 0xdff   :  { %v1142_v32 = vmul.f32 %v1140_v30, %v1137_v28  ;;  %v561_v28 = vcombine.high %v559_v3, %v559_v3 }
 0xe01   :  { %v1144_v33 = vadd.f32 %v1143_v31, %v1142_v32 }
 0xe03   :  { %v1152_v35 = vrot.slane %v1144_v33, %v3761_v63 }
 0xe05   :  { %1153 = vrot.lane.b32.xlu0 %v1152_v35, %s3393_s6 }
 0xe77   :  { %v1154_v36 = vpop.permute.xlu0 %1153 }
 0xe78   :  { %3034 = vmatmul.mubr.msk.f32.vlgmr.msra.gmra.mrb[4].mxu0 %vm570_vm12, %v1154_v36 }
 0xe79   :  { %3212 = vmatpush3.bf16.msra.mxu0 %v3689_v18  ;;  %3055 = vmatprep.mubr.msk.f32.mxu0 %vm3389_vm8, %v3390_v23 }
 0xe7a   :  { %3213 = vmatprep.subr.bf16.mxu0 %v3388_v9 }
 0xe7d   :  { %3215 = vmatpush3.bf16.msra.mxu0 %v3705_v17 }
 0xe7e   :  { %3216 = vmatprep.subr.bf16.mxu0 %v3388_v9 }
 0xf4b   :  { %v1223_v37 = vpop.f32.mrb[4].mxu0 }
 0xf4c   :  { %v1234_v38 = vadd.f32 %v1223_v37, %v3797_v29  ;;  %v3035_v34 = vpop.f32.mrb[5].mxu0  ;;  %v1227_v42 = vadd.f32 %v1223_v37, %v560_v40 }
 0xf4d   :  { %v289_v34 = vld [vmem:[%s4253_s8] sm:$0x7] }
 0xf4e   :  { %v1242_v39 = vrot.slane %v1234_v38, %v3761_v63  ;;  %v2842_v18 = vmul.f32 -1.442695, %v1227_v42  ;;  %3058 = vmatprep.subr.msk.mxu1 %vm1546_vm13, %v289_v34 }
 0xf50   :  { %1243 = vrot.lane.b32.xlu1 %v1242_v39, %s3391_s21  ;;  %3319 = vpow2.f32 %v2842_v18  ;;  %v290_v39 = vld [vmem:[%s4254_s9] sm:$0xff] }
 0xf51   :  { %v73_v18 = vld [vmem:[%s4255_s3] sm:$0x3] }
 0xf5a   :  { %v3320_v47 = vpop.eup %3319 }
 0xf5b   :  { %v1231_v50 = vadd.f32 1.0, %v3320_v47  ;;  %v74_v47 = vld [vmem:[%s4255_s3 + $0x2] sm:$0x3] }
 0xf5d   :  { %3321 = vrcp.f32 %v1231_v50  ;;  %v75_v50 = vld [vmem:[%s4255_s3 + $0x4] sm:$0x3] }
 0xf67   :  { %v3322_v51 = vpop.eup %3321 }
 0xf68   :  { %v1253_v54 = vsub.f32 1.0, %v3322_v51  ;;  %v1259_v0 = vmul.f32 %v3322_v51, %v1144_v33 }
 0xfc2   :  { %v1244_v52 = vpop.permute.xlu1 %1243 }
 0xfc3   :  { %v1246_v17 = vmul.f32 %v3322_v51, %v1244_v52  ;;  %v76_v51 = vld [vmem:[%s4255_s3 + $0x6] sm:$0x3]  ;;  %v200_v52 = vsub.f32 %v73_v18, %v3539_v41 }
 0xfc5   :  { %1248 = vrot.lane.b32.xlu0 %v1246_v17, %s3391_s21  ;;  %v201_v17 = vsub.f32 %v74_v47, %v3539_v41 }
0x1037   :  { %v1249_v53 = vpop.permute.xlu0 %1248 }
0x1038   :  { %v1251_v59 = vadd.f32 %v1249_v53, %v560_v40  ;;  %v291_v40 = vld [vmem:[%s4254_s9 + $0x8] sm:$0xff]  ;;  %v202_v53 = vsub.f32 %v75_v50, %v3539_v41 }
0x1039   :  { %v3917_v42 = vpack.c.bf16 %v291_v40, %v290_v39 }
0x103a   :  { %3323 = vtanh.f32 %v1251_v59  ;;  %v77_v59 = vld [vmem:[%s4255_s3 + $0x8] sm:$0x3] }
0x1044   :  { %v3324_v60 = vpop.eup %3323 }
0x1045   :  { %1255 = vrot.lane.b32.xlu1 %v3324_v60, %s3393_s6  ;;  %v78_v60 = vld [vmem:[%s4255_s3 + $0xa] sm:$0x3] }
0x10b7   :  { %v1256_v56 = vpop.permute.xlu1 %1255 }
0x10b8   :  { %v1258_v57 = vmul.f32 %v1256_v56, %v1253_v54  ;;  %v203_v54 = vsub.f32 %v76_v51, %v3539_v41  ;;  %v79_v56 = vld [vmem:[%s4255_s3 + $0xc] sm:$0x3] }
0x10ba   :  { %v1260_v45 = vadd.f32 %v1259_v0, %v1258_v57  ;;  %v80_v0 = vld [vmem:[%s4255_s3 + $0xe] sm:$0x3]  ;;  %v204_v57 = vsub.f32 %v77_v59, %v3539_v41 }
0x10bc   :  { %v1268_v1 = vrot.slane %v1260_v45, %v3761_v63 }
0x10be   :  { %1269 = vrot.lane.b32.xlu0 %v1268_v1, %s3393_s6  ;;  %v292_v1 = vld [vmem:[%s4254_s9 + $0x10] sm:$0xff] }
0x1130   :  { %v1270_v62 = vpop.permute.xlu0 %1269 }
0x1131   :  { %3045 = vmatmul.mubr.msk.f32.vlgmr.msra.gmra.mrb[8].mxu1 %vm570_vm12, %v1270_v62  ;;  %v208_v62 = vmul.f32 %v3646_v58, %v200_v52 }
0x1132   :  { %3059 = vmatpush3.msk.msra.mxu1 %vm1546_vm13, %v289_v34 }
0x1133   :  { %3222 = vmatprep.subr.bf16.mxu1 %v3388_v9 }
0x1204   :  { %v1339_v2 = vpop.f32.mrb[8].mxu1 }
0x1205   :  { %v1350_v46 = vadd.f32 %v1339_v2, %v3797_v29  ;;  %v3046_v44 = vpop.f32.mrb[9].mxu1  ;;  %v1343_v6 = vadd.f32 %v1339_v2, %v559_v3  ;;  %v209_v2 = vmul.f32 %v3646_v58, %v201_v17 }
0x1206   :  { %v206_v44 = vsub.f32 %v79_v56, %v3539_v41 }
0x1207   :  { %v1358_v48 = vrot.slane %v1350_v46, %v3761_v63  ;;  %v2844_v55 = vmul.f32 -1.442695, %v1343_v6  ;;  %v210_v46 = vmul.f32 %v3646_v58, %v202_v53  ;;  %v207_v6 = vsub.f32 %v80_v0, %v3539_v41 }
0x1209   :  { %1359 = vrot.lane.b32.xlu1 %v1358_v48, %s3391_s21  ;;  %3325 = vpow2.f32 %v2844_v55  ;;  %v293_v48 = vld [vmem:[%s4254_s9 + $0x18] sm:$0xff]  ;;  %v212_v55 = vmul.f32 %v3646_v58, %v204_v57 }
0x1213   :  { %v3326_v7 = vpop.eup %3325 }
0x1214   :  { %v1347_v43 = vadd.f32 1.0, %v3326_v7 }
0x1216   :  { %3327 = vrcp.f32 %v1347_v43  ;;  %v1507_v43 = vcombine.low %v208_v62, %v209_v2 }
0x1220   :  { %v3328_v8 = vpop.eup %3327 }
0x1221   :  { %v1369_v27 = vsub.f32 1.0, %v3328_v8  ;;  %v1375_v20 = vmul.f32 %v3328_v8, %v1260_v45  ;;  %v205_v45 = vsub.f32 %v78_v60, %v3539_v41 }
0x1223   :  { %v213_v7 = vmul.f32 %v3646_v58, %v205_v45 }
0x127b   :  { %v1360_v10 = vpop.permute.xlu1 %1359 }
0x127c   :  { %v1362_v16 = vmul.f32 %v3328_v8, %v1360_v10  ;;  %v214_v8 = vmul.f32 %v3646_v58, %v206_v44  ;;  %v3968_v10 = vpack.c.bf16 %v293_v48, %v292_v1 }
0x127e   :  { %1364 = vrot.lane.b32.xlu0 %v1362_v16, %s3391_s21 }
0x12f0   :  { %v1365_v15 = vpop.permute.xlu0 %1364 }
0x12f1   :  { %v1367_v61 = vadd.f32 %v1365_v15, %v559_v3  ;;  %v211_v3 = vmul.f32 %v3646_v58, %v203_v54  ;;  %v215_v15 = vmul.f32 %v3646_v58, %v207_v6  ;;  %v2827_v58 = vld [vmem:[%s4256_s11] ss:$0 sm:$0xff] }
0x12f3   :  { %3329 = vtanh.f32 %v1367_v61  ;;  %v1508_v16 = vcombine.low %v210_v46, %v211_v3  ;;  %v1524_v61 = vcombine.low %v212_v55, %v213_v7 }
0x12f5   :  { %v1522_v41 = vrot.slane %v1508_v16, %v3761_v63 }
0x12fd   :  { %v3330_v12 = vpop.eup %3329 }
0x12fe   :  { %1371 = vrot.lane.b32.xlu1 %v3330_v12, %s3393_s6  ;;  %v1515_v12 = vrot.slane %v1507_v43, %v3761_v63 }
0x1370   :  { %v1372_v13 = vpop.permute.xlu1 %1371 }
0x1371   :  { %v1374_v19 = vmul.f32 %v1372_v13, %v1369_v27  ;;  %v1525_v27 = vcombine.low %v214_v8, %v215_v15  ;;  %v1532_v13 = vrot.slane %v1524_v61, %v3761_v63 }
0x1373   :  { %v3893_v11 = vadd.f32 %v1375_v20, %v1374_v19  ;;  %v1523_v20 = vcombine.low %v1515_v12, %v1522_v41  ;;  %v1539_v19 = vrot.slane %v1525_v27, %v3761_v63 }
0x1375   :  { %v1384_v14 = vrot.slane %v3893_v11, %v3761_v63  ;;  %3060 = vmatprep.mubr.msk.f32.mxu1 %vm1541_vm14, %v1523_v20 }
0x1377   :  { %1385 = vrot.lane.b32.xlu0 %v1384_v14, %s3393_s6  ;;  %v1540_v14 = vcombine.low %v1532_v13, %v1539_v19 }
0x1379   :  { %3061 = vmatmul.mubr.msk.f32.vlgmr.msra.gmra.mrb[10].mxu1 %vm1541_vm14, %v1540_v14 }
0x137a   :  { %3224 = vmatpush3.bf16.msra.mxu1 %v3917_v42  ;;  %3082 = vmatprep.mubr.msk.f32.mxu1 %vm3389_vm8, %v3390_v23 }
0x137b   :  { %3225 = vmatprep.subr.bf16.mxu1 %v3388_v9 }
0x137e   :  { %3227 = vmatpush3.bf16.msra.mxu1 %v3968_v10 }
0x137f   :  { %3234 = vmatprep.subr.bf16.mxu1 %v3388_v9 }
0x13e9   :  { %v1386_v21 = vpop.permute.xlu0 %1385 }
0x13ea   :  { %3056 = vmatmul.mubr.msk.f32.vlgmr.msra.gmra.mrb[6].mxu0 %vm570_vm12, %v1386_v21 }
0x13eb   :  { %3071 = vmatprep.mubr.msk.f32.mxu0 %vm3389_vm8, %v3390_v23  ;;  %3218 = vmatpush3.bf16.msra.mxu0 %v3917_v42 }
0x13ec   :  { %3219 = vmatprep.subr.bf16.mxu0 %v3388_v9 }
0x13ef   :  { %3221 = vmatpush3.bf16.msra.mxu0 %v3968_v10 }
0x13f0   :  { %3228 = vmatprep.subr.bf16.mxu0 %v3388_v9 }
0x14bd   :  { %v1455_v22 = vpop.f32.mrb[6].mxu0 }
0x14be   :  { %v1466_v24 = vadd.f32 %v1455_v22, %v3797_v29  ;;  %v3057_v25 = vpop.f32.mrb[7].mxu0  ;;  %v1459_v30 = vadd.f32 %v1455_v22, %v561_v28 }
0x14c0   :  { %v1474_v26 = vrot.slane %v1466_v24, %v3761_v63  ;;  %v2846_v31 = vmul.f32 -1.442695, %v1459_v30  ;;  %v3062_v30 = vpop.f32.mrb[10].mxu1 }
0x14c2   :  { %1475 = vrot.lane.b32.xlu1 %v1474_v26, %s3391_s21  ;;  %3331 = vpow2.f32 %v2846_v31  ;;  %v2847_v31 = vld [vmem:[%s4257_s10] ss:$0 sm:$0xff] }
0x14cc   :  { %v3332_v32 = vpop.eup %3331 }
0x14cd   :  { %v1463_v33 = vadd.f32 1.0, %v3332_v32  ;;  %v3995_v32 = vadd.f32 %v3062_v30, %v2847_v31 }
0x14cf   :  { %3333 = vrcp.f32 %v1463_v33  ;;  %v1616_v33 = vpop.f32.mrb[11].mxu1 }
0x14d0   :  { %v4009_v34 = vadd.f32 %v2847_v31, %v1616_v33 }
0x14d2   :  { %v1634_v39 = vrot.slane %v4009_v34, %v3761_v63 }
0x14d9   :  { %v3904_v35 = vpop.eup %3333 }
0x14da   :  { %v1485_v21 = vsub.f32 1.0, %v3904_v35  ;;  %v1491_v24 = vmul.f32 %v3904_v35, %v3893_v11 }
0x1534   :  { %v1476_v36 = vpop.permute.xlu1 %1475 }
0x1535   :  { %v1478_v37 = vmul.f32 %v3904_v35, %v1476_v36 }
0x1537   :  { %1480 = vrot.lane.b32.xlu0 %v1478_v37, %s3391_s21 }
0x15a9   :  { %v1481_v29 = vpop.permute.xlu0 %1480 }
0x15aa   :  { %v1483_v38 = vadd.f32 %v1481_v29, %v561_v28 }
0x15ac   :  { %3335 = vtanh.f32 %v1483_v38 }
0x15b6   :  { %v3336_v49 = vpop.eup %3335 }
0x15b7   :  { %1487 = vrot.lane.b32.xlu1 %v3336_v49, %s3393_s6  ;;  %v1642_v49 = vcombine.high %v1634_v39, %v1634_v39 }
0x15bb   :  { %1758 = vrot.lane.b32.xlu1 %v2827_v58, %s3391_s21 }
0x1629   :  { %v1488_v22 = vpop.permute.xlu1 %1487 }
0x162a   :  { %v1490_v25 = vmul.f32 %v1488_v22, %v1485_v21 }
0x162c   :  { %v1492_v26 = vadd.f32 %v1491_v24, %v1490_v25 }
0x162d   :  { %v4004_v11 = vpop.permute.xlu1 %1758 }
0x162e   :  { %v1676_v28 = vrot.slane %v1492_v26, %v3761_v63 }
0x1630   :  { %1677 = vrot.lane.b32.xlu0 %v1676_v28, %s3393_s6 }
0x16a2   :  { %v1678_v36 = vpop.permute.xlu0 %1677 }
0x16a3   :  { %3072 = vmatmul.mubr.msk.f32.vlgmr.msra.gmra.mrb[8].mxu0 %vm570_vm12, %v1678_v36 }
0x16a4   :  { %3230 = vmatpush3.bf16.msra.mxu0 %v3917_v42  ;;  %3093 = vmatprep.mubr.msk.f32.mxu0 %vm3389_vm8, %v3390_v23 }
0x16a5   :  { %3231 = vmatprep.subr.bf16.mxu0 %v3388_v9 }
0x16a8   :  { %3233 = vmatpush3.bf16.msra.mxu0 %v3968_v10 }
0x16a9   :  { %3240 = vmatprep.subr.bf16.mxu0 %v3388_v9 }
0x1776   :  { %v1747_v35 = vpop.f32.mrb[8].mxu0 }
0x1777   :  { %v1761_v37 = vadd.f32 %v4004_v11, %v1747_v35  ;;  %v3073_v29 = vpop.f32.mrb[9].mxu0  ;;  %v1751_v40 = vadd.f32 %v1747_v35, %v1634_v39 }
0x1779   :  { %v1769_v38 = vrot.slane %v1761_v37, %v3761_v63  ;;  %v2852_v18 = vmul.f32 -1.442695, %v1751_v40 }
0x177b   :  { %1770 = vrot.lane.b32.xlu0 %v1769_v38, %s3391_s21  ;;  %3337 = vpow2.f32 %v2852_v18 }
0x1785   :  { %v3338_v47 = vpop.eup %3337 }
0x1786   :  { %v1755_v50 = vadd.f32 1.0, %v3338_v47 }
0x1788   :  { %3339 = vrcp.f32 %v1755_v50 }
0x1792   :  { %v3340_v51 = vpop.eup %3339 }
0x1793   :  { %v1780_v54 = vsub.f32 1.0, %v3340_v51  ;;  %v1786_v0 = vmul.f32 %v3340_v51, %v1492_v26  ;;  %v1627_v26 = vcombine.high %v4009_v34, %v4009_v34 }
0x1795   :  { %v1641_v28 = vrot.slane %v1627_v26, %v3761_v63 }
0x17ed   :  { %v1771_v52 = vpop.permute.xlu0 %1770 }
0x17ee   :  { %v1773_v17 = vmul.f32 %v3340_v51, %v1771_v52 }
0x17f0   :  { %1775 = vrot.lane.b32.xlu1 %v1773_v17, %s3391_s21 }
0x1862   :  { %v1776_v53 = vpop.permute.xlu1 %1775 }
0x1863   :  { %v1778_v59 = vadd.f32 %v1776_v53, %v1634_v39 }
0x1865   :  { %3341 = vtanh.f32 %v1778_v59 }
0x186f   :  { %v3342_v60 = vpop.eup %3341 }
0x1870   :  { %1782 = vrot.lane.b32.xlu0 %v3342_v60, %s3393_s6 }
0x18e2   :  { %v1783_v56 = vpop.permute.xlu0 %1782 }
0x18e3   :  { %v1785_v57 = vmul.f32 %v1783_v56, %v1780_v54  ;;  %v1643_v56 = vcombine.high %v1641_v28, %v1641_v28 }
0x18e5   :  { %v4015_v45 = vadd.f32 %v1786_v0, %v1785_v57 }
0x18e7   :  { %v1795_v1 = vrot.slane %v4015_v45, %v3761_v63 }
0x18e9   :  { %1796 = vrot.lane.b32.xlu1 %v1795_v1, %s3393_s6 }
0x195b   :  { %v1797_v62 = vpop.permute.xlu1 %1796 }
0x195c   :  { %2619 = vst.msk [vmem:[%s4258_s15] sm:$0x3] %vm2618_vm15, %v1797_v62  ;;  %3083 = vmatmul.mubr.msk.f32.vlgmr.msra.gmra.mrb[12].mxu1 %vm570_vm12, %v1797_v62 }
0x195d   :  { %3236 = vmatpush3.bf16.msra.mxu1 %v3917_v42  ;;  %3104 = vmatprep.mubr.msk.f32.mxu1 %vm3389_vm8, %v3390_v23 }
0x195e   :  { %3237 = vmatprep.subr.bf16.mxu1 %v3388_v9 }
0x1961   :  { %3239 = vmatpush3.bf16.msra.mxu1 %v3968_v10 }
0x1962   :  { %3246 = vmatprep.subr.bf16.mxu1 %v3388_v9 }
0x1a2f   :  { %v1866_v2 = vpop.f32.mrb[12].mxu1 }
0x1a30   :  { %v1877_v46 = vadd.f32 %v1866_v2, %v4004_v11  ;;  %v3084_v44 = vpop.f32.mrb[13].mxu1  ;;  %v1870_v3 = vadd.f32 %v1866_v2, %v1642_v49 }
0x1a32   :  { %v1885_v48 = vrot.slane %v1877_v46, %v3761_v63  ;;  %v2854_v6 = vmul.f32 -1.442695, %v1870_v3 }
0x1a34   :  { %1886 = vrot.lane.b32.xlu0 %v1885_v48, %s3391_s21  ;;  %3343 = vpow2.f32 %v2854_v6 }
0x1a3e   :  { %v3344_v55 = vpop.eup %3343 }
0x1a3f   :  { %v1874_v7 = vadd.f32 1.0, %v3344_v55 }
0x1a41   :  { %3345 = vrcp.f32 %v1874_v7 }
0x1a4b   :  { %v3346_v43 = vpop.eup %3345 }
0x1a4c   :  { %v1896_v41 = vsub.f32 1.0, %v3346_v43  ;;  %v1902_v13 = vmul.f32 %v3346_v43, %v4015_v45 }
0x1aa6   :  { %v1887_v8 = vpop.permute.xlu0 %1886 }
0x1aa7   :  { %v1889_v16 = vmul.f32 %v3346_v43, %v1887_v8 }
0x1aa9   :  { %1891 = vrot.lane.b32.xlu1 %v1889_v16, %s3391_s21 }
0x1b1b   :  { %v1892_v15 = vpop.permute.xlu1 %1891 }
0x1b1c   :  { %v1894_v61 = vadd.f32 %v1892_v15, %v1642_v49 }
0x1b1e   :  { %3347 = vtanh.f32 %v1894_v61 }
0x1b28   :  { %v3348_v12 = vpop.eup %3347 }
0x1b29   :  { %1898 = vrot.lane.b32.xlu0 %v3348_v12, %s3393_s6 }
0x1b9b   :  { %v1899_v27 = vpop.permute.xlu0 %1898 }
0x1b9c   :  { %v1901_v20 = vmul.f32 %v1899_v27, %v1896_v41 }
0x1b9e   :  { %v4037_v19 = vadd.f32 %v1902_v13, %v1901_v20  ;;  %v1651_v13 = vrot.slane %v3995_v32, %v3761_v63 }
0x1ba0   :  { %v1911_v14 = vrot.slane %v4037_v19, %v3761_v63 }
0x1ba2   :  { %1912 = vrot.lane.b32.xlu1 %v1911_v14, %s3393_s6 }
0x1c14   :  { %v1913_v58 = vpop.permute.xlu1 %1912 }
0x1c15   :  { %2620 = vst.msk [vmem:[%s4258_s15 + $0x2] sm:$0x3] %vm2618_vm15, %v1913_v58  ;;  %3094 = vmatmul.mubr.msk.f32.vlgmr.msra.gmra.mrb[10].mxu0 %vm570_vm12, %v1913_v58 }
0x1c16   :  { %3242 = vmatpush3.bf16.msra.mxu0 %v3917_v42  ;;  %3115 = vmatprep.mubr.msk.f32.mxu0 %vm3389_vm8, %v3390_v23 }
0x1c17   :  { %3243 = vmatprep.subr.bf16.mxu0 %v3388_v9 }
0x1c1a   :  { %3245 = vmatpush3.bf16.msra.mxu0 %v3968_v10 }
0x1c1b   :  { %3252 = vmatprep.subr.bf16.mxu0 %v3388_v9 }
0x1ce8   :  { %v1982_v21 = vpop.f32.mrb[10].mxu0 }
0x1ce9   :  { %v1993_v22 = vadd.f32 %v1982_v21, %v4004_v11  ;;  %v3095_v24 = vpop.f32.mrb[11].mxu0  ;;  %v1986_v30 = vadd.f32 %v1982_v21, %v1641_v28 }
0x1ceb   :  { %v2001_v25 = vrot.slane %v1993_v22, %v3761_v63  ;;  %v2856_v31 = vmul.f32 -1.442695, %v1986_v30 }
0x1ced   :  { %2002 = vrot.lane.b32.xlu0 %v2001_v25, %s3391_s21  ;;  %3349 = vpow2.f32 %v2856_v31 }
0x1cf7   :  { %v3350_v33 = vpop.eup %3349 }
0x1cf8   :  { %v1990_v36 = vadd.f32 1.0, %v3350_v33 }
0x1cfa   :  { %3351 = vrcp.f32 %v1990_v36 }
0x1d04   :  { %v3352_v35 = vpop.eup %3351 }
0x1d05   :  { %v2012_v34 = vsub.f32 1.0, %v3352_v35  ;;  %v2018_v47 = vmul.f32 %v3352_v35, %v4037_v19 }
0x1d5f   :  { %v2003_v37 = vpop.permute.xlu0 %2002 }
0x1d60   :  { %v2005_v29 = vmul.f32 %v3352_v35, %v2003_v37 }
0x1d62   :  { %2007 = vrot.lane.b32.xlu1 %v2005_v29, %s3391_s21 }
0x1dd4   :  { %v2008_v38 = vpop.permute.xlu1 %2007 }
0x1dd5   :  { %v2010_v39 = vadd.f32 %v2008_v38, %v1641_v28 }
0x1dd7   :  { %3353 = vtanh.f32 %v2010_v39 }
0x1de1   :  { %v3354_v40 = vpop.eup %3353 }
0x1de2   :  { %2014 = vrot.lane.b32.xlu0 %v3354_v40, %s3393_s6 }
0x1e54   :  { %v2015_v18 = vpop.permute.xlu0 %2014 }
0x1e55   :  { %v2017_v50 = vmul.f32 %v2015_v18, %v2012_v34 }
0x1e57   :  { %v4062_v51 = vadd.f32 %v2018_v47, %v2017_v50  ;;  %v1659_v47 = vcombine.high %v1651_v13, %v1651_v13 }
0x1e59   :  { %v2027_v52 = vrot.slane %v4062_v51, %v3761_v63 }
0x1e5b   :  { %2028 = vrot.lane.b32.xlu1 %v2027_v52, %s3393_s6 }
0x1ecd   :  { %v2029_v17 = vpop.permute.xlu1 %2028 }
0x1ece   :  { %2621 = vst.msk [vmem:[%s4258_s15 + $0x4] sm:$0x3] %vm2618_vm15, %v2029_v17  ;;  %3105 = vmatmul.mubr.msk.f32.vlgmr.msra.gmra.mrb[14].mxu1 %vm570_vm12, %v2029_v17 }
0x1ecf   :  { %3248 = vmatpush3.bf16.msra.mxu1 %v3917_v42  ;;  %3126 = vmatprep.mubr.msk.f32.mxu1 %vm3389_vm8, %v3390_v23 }
0x1ed0   :  { %3249 = vmatprep.subr.bf16.mxu1 %v3388_v9 }
0x1ed3   :  { %3251 = vmatpush3.bf16.msra.mxu1 %v3968_v10 }
0x1ed4   :  { %3258 = vmatprep.subr.bf16.mxu1 %v3388_v9 }
0x1fa1   :  { %v2098_v53 = vpop.f32.mrb[14].mxu1 }
0x1fa2   :  { %v2109_v59 = vadd.f32 %v2098_v53, %v4004_v11  ;;  %v3106_v60 = vpop.f32.mrb[15].mxu1  ;;  %v2102_v0 = vadd.f32 %v2098_v53, %v1643_v56 }
0x1fa4   :  { %v2117_v54 = vrot.slane %v2109_v59, %v3761_v63  ;;  %v2858_v57 = vmul.f32 -1.442695, %v2102_v0 }
0x1fa6   :  { %2118 = vrot.lane.b32.xlu0 %v2117_v54, %s3391_s21  ;;  %3355 = vpow2.f32 %v2858_v57 }
0x1fb0   :  { %v3356_v1 = vpop.eup %3355 }
0x1fb1   :  { %v2106_v62 = vadd.f32 1.0, %v3356_v1 }
0x1fb3   :  { %3357 = vrcp.f32 %v2106_v62 }
0x1fbd   :  { %v3358_v2 = vpop.eup %3357 }
0x1fbe   :  { %v2128_v6 = vsub.f32 1.0, %v3358_v2  ;;  %v2134_v7 = vmul.f32 %v3358_v2, %v4062_v51 }
0x2018   :  { %v2119_v46 = vpop.permute.xlu0 %2118 }
0x2019   :  { %v2121_v44 = vmul.f32 %v3358_v2, %v2119_v46 }
0x201b   :  { %2123 = vrot.lane.b32.xlu1 %v2121_v44, %s3391_s21 }
0x208d   :  { %v2124_v48 = vpop.permute.xlu1 %2123 }
0x208e   :  { %v2126_v49 = vadd.f32 %v2124_v48, %v1643_v56 }
0x2090   :  { %3359 = vtanh.f32 %v2126_v49 }
0x209a   :  { %v3360_v3 = vpop.eup %3359 }
0x209b   :  { %2130 = vrot.lane.b32.xlu0 %v3360_v3, %s3393_s6  ;;  %v1644_v3 = vcombine.high %v3995_v32, %v3995_v32 }
0x210d   :  { %v2131_v55 = vpop.permute.xlu0 %2130 }
0x210e   :  { %v2133_v43 = vmul.f32 %v2131_v55, %v2128_v6  ;;  %v1658_v6 = vrot.slane %v1644_v3, %v3761_v63 }
0x2110   :  { %v4084_v8 = vadd.f32 %v2134_v7, %v2133_v43 }
0x2112   :  { %v2143_v16 = vrot.slane %v4084_v8, %v3761_v63 }
0x2114   :  { %2144 = vrot.lane.b32.xlu1 %v2143_v16, %s3393_s6 }
0x2186   :  { %v2145_v15 = vpop.permute.xlu1 %2144 }
0x2187   :  { %2622 = vst.msk [vmem:[%s4258_s15 + $0x6] sm:$0x3] %vm2618_vm15, %v2145_v15  ;;  %3116 = vmatmul.mubr.msk.f32.vlgmr.msra.gmra.mrb[12].mxu0 %vm570_vm12, %v2145_v15 }
0x2188   :  { %3254 = vmatpush3.bf16.msra.mxu0 %v3917_v42  ;;  %3137 = vmatprep.mubr.msk.f32.mxu0 %vm3389_vm8, %v3390_v23 }
0x2189   :  { %3255 = vmatprep.subr.bf16.mxu0 %v3388_v9 }
0x218c   :  { %3257 = vmatpush3.bf16.msra.mxu0 %v3968_v10 }
0x225a   :  { %v2214_v61 = vpop.f32.mrb[12].mxu0 }
0x225b   :  { %v2225_v12 = vadd.f32 %v2214_v61, %v4004_v11  ;;  %v3117_v41 = vpop.f32.mrb[13].mxu0  ;;  %v2218_v20 = vadd.f32 %v2214_v61, %v1651_v13 }
0x225d   :  { %v2233_v27 = vrot.slane %v2225_v12, %v3761_v63  ;;  %v2860_v14 = vmul.f32 -1.442695, %v2218_v20 }
0x225f   :  { %2234 = vrot.lane.b32.xlu0 %v2233_v27, %s3391_s21  ;;  %3361 = vpow2.f32 %v2860_v14 }
0x2269   :  { %v3362_v58 = vpop.eup %3361 }
0x226a   :  { %v2222_v21 = vadd.f32 1.0, %v3362_v58 }
0x226c   :  { %3363 = vrcp.f32 %v2222_v21 }
0x2276   :  { %v3364_v22 = vpop.eup %3363 }
0x2277   :  { %v2244_v31 = vsub.f32 1.0, %v3364_v22  ;;  %v2250_v36 = vmul.f32 %v3364_v22, %v4084_v8 }
0x22d1   :  { %v2235_v24 = vpop.permute.xlu0 %2234 }
0x22d2   :  { %v2237_v25 = vmul.f32 %v3364_v22, %v2235_v24 }
0x22d4   :  { %2239 = vrot.lane.b32.xlu1 %v2237_v25, %s3391_s21 }
0x2346   :  { %v2240_v26 = vpop.permute.xlu1 %2239 }
0x2347   :  { %v2242_v28 = vadd.f32 %v2240_v26, %v1651_v13 }
0x2349   :  { %3365 = vtanh.f32 %v2242_v28 }
0x2353   :  { %v3366_v30 = vpop.eup %3365 }
0x2354   :  { %2246 = vrot.lane.b32.xlu0 %v3366_v30, %s3393_s6 }
0x23c6   :  { %v2247_v33 = vpop.permute.xlu0 %2246 }
0x23c7   :  { %v2249_v35 = vmul.f32 %v2247_v33, %v2244_v31  ;;  %v1660_v31 = vcombine.high %v1658_v6, %v1658_v6 }
0x23c9   :  { %v4107_v37 = vadd.f32 %v2250_v36, %v2249_v35 }
0x23cb   :  { %v2259_v29 = vrot.slane %v4107_v37, %v3761_v63 }
0x23cd   :  { %2260 = vrot.lane.b32.xlu1 %v2259_v29, %s3393_s6 }
0x243f   :  { %v2261_v38 = vpop.permute.xlu1 %2260 }
0x2440   :  { %2623 = vst.msk [vmem:[%s4258_s15 + $0x8] sm:$0x3] %vm2618_vm15, %v2261_v38  ;;  %3127 = vmatmul.mubr.msk.f32.vlgmr.msra.gmra.mrb[16].mxu1 %vm570_vm12, %v2261_v38  ;;  %v2634_v38 = vcombine.low %v4062_v51, %v4084_v8 }
0x2441   :  { %3260 = vmatpush3.bf16.msra.mxu1 %v3917_v42  ;;  %3148 = vmatprep.mubr.msk.f32.mxu1 %vm3389_vm8, %v3390_v23 }
0x2442   :  { %3261 = vmatprep.subr.bf16.mxu1 %v3388_v9 }
0x2445   :  { %3263 = vmatpush3.bf16.msra.mxu1 %v3968_v10 }
0x2513   :  { %v2330_v39 = vpop.f32.mrb[16].mxu1 }
0x2514   :  { %v2341_v40 = vadd.f32 %v2330_v39, %v4004_v11  ;;  %v3128_v34 = vpop.f32.mrb[17].mxu1  ;;  %v2334_v50 = vadd.f32 %v2330_v39, %v1659_v47  ;;  %v2633_v39 = vcombine.low %v4015_v45, %v4037_v19  ;;  %v295_v45 = vld [vmem:[%s4259_s12] sm:$0xff]  ;;  %v296_v19 = vld [vmem:[%s4259_s12 + $0x8] sm:$0xff] }
0x2515   :  { %v3264_v8 = vpack.c.bf16 %v296_v19, %v295_v45 }
0x2516   :  { %v2349_v18 = vrot.slane %v2341_v40, %v3761_v63  ;;  %v2862_v52 = vmul.f32 -1.442695, %v2334_v50 }
0x2517   :  { %3265 = vmatprep.subr.bf16.mxu0 %v3264_v8 }
0x2518   :  { %2350 = vrot.lane.b32.xlu0 %v2349_v18, %s3391_s21  ;;  %3367 = vpow2.f32 %v2862_v52  ;;  %v2648_v18 = vrot.slane %v2634_v38, %v3761_v63 }
0x2522   :  { %v3368_v42 = vpop.eup %3367 }
0x2523   :  { %v2338_v17 = vadd.f32 1.0, %v3368_v42 }
0x2525   :  { %3369 = vrcp.f32 %v2338_v17 }
0x252f   :  { %v3370_v23 = vpop.eup %3369 }
0x2530   :  { %v2360_v54 = vsub.f32 1.0, %v3370_v23  ;;  %v2366_v0 = vmul.f32 %v3370_v23, %v4107_v37 }
0x258a   :  { %v2351_v53 = vpop.permute.xlu0 %2350 }
0x258b   :  { %v2353_v9 = vmul.f32 %v3370_v23, %v2351_v53  ;;  %v297_v23 = vld [vmem:[%s4259_s12 + $0x10] sm:$0xff]  ;;  %v298_v53 = vld [vmem:[%s4259_s12 + $0x18] sm:$0xff] }
0x258d   :  { %2355 = vrot.lane.b32.xlu1 %v2353_v9, %s3391_s21  ;;  %v3268_v9 = vpack.c.bf16 %v298_v53, %v297_v23 }
0x25ff   :  { %v2356_v10 = vpop.permute.xlu1 %2355 }
0x2600   :  { %v2358_v59 = vadd.f32 %v2356_v10, %v1659_v47  ;;  %v2641_v47 = vrot.slane %v2633_v39, %v3761_v63 }
0x2602   :  { %3371 = vtanh.f32 %v2358_v59  ;;  %v2649_v50 = vcombine.low %v2641_v47, %v2648_v18 }
0x260c   :  { %v3372_v60 = vpop.eup %3371 }
0x260d   :  { %2362 = vrot.lane.b32.xlu0 %v3372_v60, %s3393_s6 }
0x267f   :  { %v2363_v56 = vpop.permute.xlu0 %2362 }
0x2680   :  { %v2365_v57 = vmul.f32 %v2363_v56, %v2360_v54 }
0x2682   :  { %v4128_v1 = vadd.f32 %v2366_v0, %v2365_v57 }
0x2684   :  { %v2375_v62 = vrot.slane %v4128_v1, %v3761_v63  ;;  %v2650_v56 = vcombine.low %v4107_v37, %v4128_v1 }
0x2686   :  { %2376 = vrot.lane.b32.xlu1 %v2375_v62, %s3393_s6 }
0x26f8   :  { %v2377_v2 = vpop.permute.xlu1 %2376 }
0x26f9   :  { %2624 = vst.msk [vmem:[%s4258_s15 + $0xa] sm:$0x3] %vm2618_vm15, %v2377_v2  ;;  %3138 = vmatmul.mubr.msk.f32.vlgmr.msra.gmra.mrb[14].mxu0 %vm570_vm12, %v2377_v2  ;;  %v2658_v2 = vrot.slane %v2650_v56, %v3761_v63 }
0x26fa   :  { %3267 = vmatpush3.bf16.msra.mxu0 %v3264_v8 }
0x26fb   :  { %3269 = vmatprep.subr.bf16.mxu0 %v3268_v9 }
0x26fe   :  { %3271 = vmatpush3.bf16.msra.mxu0 %v3268_v9 }
0x27cc   :  { %v2446_v46 = vpop.f32.mrb[14].mxu0 }
0x27cd   :  { %v2457_v44 = vadd.f32 %v2446_v46, %v4004_v11  ;;  %v3139_v48 = vpop.f32.mrb[15].mxu0  ;;  %v2450_v55 = vadd.f32 %v2446_v46, %v1658_v6 }
0x27cf   :  { %v2465_v49 = vrot.slane %v2457_v44, %v3761_v63  ;;  %v2864_v7 = vmul.f32 -1.442695, %v2450_v55 }
0x27d1   :  { %2466 = vrot.lane.b32.xlu0 %v2465_v49, %s3391_s21  ;;  %3373 = vpow2.f32 %v2864_v7 }
0x27db   :  { %v3374_v43 = vpop.eup %3373 }
0x27dc   :  { %v2454_v16 = vadd.f32 1.0, %v3374_v43 }
0x27de   :  { %3375 = vrcp.f32 %v2454_v16 }
0x27e8   :  { %v3376_v15 = vpop.eup %3375 }
0x27e9   :  { %v2476_v32 = vsub.f32 1.0, %v3376_v15  ;;  %v2482_v14 = vmul.f32 %v3376_v15, %v4128_v1  ;;  %v2867_v1 = vld [vmem:[%s4260_s13] ss:$0 sm:$0xff] }
0x2843   :  { %v2467_v61 = vpop.permute.xlu0 %2466 }
0x2844   :  { %v2469_v12 = vmul.f32 %v3376_v15, %v2467_v61 }
0x2846   :  { %2471 = vrot.lane.b32.xlu1 %v2469_v12, %s3391_s21 }
0x28b8   :  { %v2472_v41 = vpop.permute.xlu1 %2471 }
0x28b9   :  { %v2474_v27 = vadd.f32 %v2472_v41, %v1658_v6 }
0x28bb   :  { %3377 = vtanh.f32 %v2474_v27 }
0x28c5   :  { %v3378_v13 = vpop.eup %3377 }
0x28c6   :  { %2478 = vrot.lane.b32.xlu0 %v3378_v13, %s3393_s6 }
0x2938   :  { %v2479_v20 = vpop.permute.xlu0 %2478 }
0x2939   :  { %v2481_v58 = vmul.f32 %v2479_v20, %v2476_v32 }
0x293b   :  { %v2483_v21 = vadd.f32 %v2482_v14, %v2481_v58 }
0x293d   :  { %v2491_v22 = vrot.slane %v2483_v21, %v3761_v63 }
0x293f   :  { %2492 = vrot.lane.b32.xlu1 %v2491_v22, %s3393_s6 }
0x29b1   :  { %v2493_v24 = vpop.permute.xlu1 %2492 }
0x29b2   :  { %2625 = vst.msk [vmem:[%s4258_s15 + $0xc] sm:$0x3] %vm2618_vm15, %v2493_v24  ;;  %3149 = vmatmul.mubr.msk.f32.vlgmr.msra.gmra.mrb[18].mxu1 %vm570_vm12, %v2493_v24 }
0x2a85   :  { %v2562_v25 = vpop.f32.mrb[18].mxu1 }
0x2a86   :  { %v2573_v26 = vadd.f32 %v2562_v25, %v4004_v11  ;;  %v3150_v28 = vpop.f32.mrb[19].mxu1  ;;  %v2566_v33 = vadd.f32 %v2562_v25, %v1660_v31 }
0x2a88   :  { %v2581_v30 = vrot.slane %v2573_v26, %v3761_v63  ;;  %v2866_v36 = vmul.f32 -1.442695, %v2566_v33 }
0x2a8a   :  { %2582 = vrot.lane.b32.xlu0 %v2581_v30, %s3391_s21  ;;  %3379 = vpow2.f32 %v2866_v36 }
0x2a94   :  { %v3380_v35 = vpop.eup %3379 }
0x2a95   :  { %v2570_v29 = vadd.f32 1.0, %v3380_v35 }
0x2a97   :  { %3381 = vrcp.f32 %v2570_v29 }
0x2aa1   :  { %v3382_v40 = vpop.eup %3381 }
0x2aa2   :  { %v2592_v10 = vsub.f32 1.0, %v3382_v40  ;;  %v2598_v60 = vmul.f32 %v3382_v40, %v2483_v21 }
0x2afc   :  { %v2583_v11 = vpop.permute.xlu0 %2582 }
0x2afd   :  { %v2585_v34 = vmul.f32 %v3382_v40, %v2583_v11 }
0x2aff   :  { %2587 = vrot.lane.b32.xlu1 %v2585_v34, %s3391_s21 }
0x2b03   :  { %2667 = vrot.lane.b32.xlu1 %v2649_v50, %s3393_s6 }
0x2b71   :  { %v2588_v52 = vpop.permute.xlu1 %2587 }
0x2b72   :  { %v2590_v42 = vadd.f32 %v2588_v52, %v1660_v31 }
0x2b74   :  { %3383 = vtanh.f32 %v2590_v42 }
0x2b75   :  { %v2668_v17 = vpop.permute.xlu1 %2667 }
0x2b76   :  { %3159 = vmatprep.mubr.msk.f32.mxu0 %vm570_vm12, %v2668_v17 }
0x2b7e   :  { %v3384_v51 = vpop.eup %3383 }
0x2b7f   :  { %2594 = vrot.lane.b32.xlu0 %v3384_v51, %s3393_s6 }
0x2bf1   :  { %v2595_v59 = vpop.permute.xlu0 %2594 }
0x2bf2   :  { %v2597_v54 = vmul.f32 %v2595_v59, %v2592_v10 }
0x2bf4   :  { %v2599_v0 = vadd.f32 %v2598_v60, %v2597_v54 }
0x2bf6   :  { %v2651_v57 = vcombine.low %v2483_v21, %v2599_v0  ;;  %v2607_v62 = vrot.slane %v2599_v0, %v3761_v63 }
0x2bf8   :  { %2608 = vrot.lane.b32.xlu1 %v2607_v62, %s3393_s6  ;;  %v2665_v46 = vrot.slane %v2651_v57, %v3761_v63 }
0x2bfa   :  { %v2666_v44 = vcombine.low %v2658_v2, %v2665_v46 }
0x2bfc   :  { %2669 = vrot.lane.b32.xlu0 %v2666_v44, %s3393_s6 }
0x2c6a   :  { %v2609_v48 = vpop.permute.xlu1 %2608 }
0x2c6b   :  { %2626 = vst.msk [vmem:[%s4258_s15 + $0xe] sm:$0x3] %vm2618_vm15, %v2609_v48 }
0x2c6e   :  { %v2670_v37 = vpop.permute.xlu0 %2669 }
0x2c6f   :  { %3160 = vmatmul.mubr.msk.f32.vlgmr.msra.gmra.mrb[16].mxu0 %vm570_vm12, %v2670_v37 }
0x2d42   :  { %v3161_v49 = vpop.f32.mrb[16].mxu0 }
0x2d43   :  { %v2747_v3 = vadd.f32 %v3161_v49, %v2867_v1  ;;  %v2741_v6 = vpop.f32.mrb[17].mxu0 }
0x2d44   :  { %v2742_v55 = vadd.f32 %v2867_v1, %v2741_v6 }
0x2d45   :  { %v2769_v7 = vcombine.high %v2747_v3, %v2747_v3  ;;  %v2776_v43 = vrot.slane %v2747_v3, %v3761_v63 }
0x2d46   :  { %v2752_v16 = vcombine.high %v2742_v55, %v2742_v55  ;;  %v2759_v15 = vrot.slane %v2742_v55, %v3761_v63 }
0x2d47   :  { %v2783_v61 = vrot.slane %v2769_v7, %v3761_v63  ;;  %v2784_v12 = vcombine.high %v2776_v43, %v2776_v43  ;;  %v2798_v41 = vmul.f32 %v2776_v43, %v3664_v4 }
0x2d48   :  { %v2766_v27 = vrot.slane %v2752_v16, %v3761_v63  ;;  %v2767_v13 = vcombine.high %v2759_v15, %v2759_v15  ;;  %v2794_v32 = vmul.f32 %v2759_v15, %v3664_v4 }
0x2d49   :  { %v2785_v20 = vcombine.high %v2783_v61, %v2783_v61  ;;  %v2799_v14 = vmul.f32 %v2784_v12, %v3664_v4  ;;  %v2800_v58 = vmul.f32 %v2783_v61, %v3664_v4  ;;  %v2806_v21 = vadd.f32 %v2798_v41, %v3589_v5 }
0x2d4a   :  { %v2768_v22 = vcombine.high %v2766_v27, %v2766_v27  ;;  %v2795_v24 = vmul.f32 %v2767_v13, %v3664_v4  ;;  %v2796_v25 = vmul.f32 %v2766_v27, %v3664_v4  ;;  %v2802_v26 = vadd.f32 %v2794_v32, %v3589_v5 }
0x2d4b   :  { %v2801_v28 = vmul.f32 %v2785_v20, %v3664_v4  ;;  %v2807_v63 = vadd.f32 %v2799_v14, %v3589_v5  ;;  %v2808_v30 = vadd.f32 %v2800_v58, %v3589_v5  ;;  %2814 = vst.msk [vmem:[%s4261_s14 + $0x8] sm:$0x3] %vm216_vm1, %v2806_v21 }
0x2d4c   :  { %v2797_v31 = vmul.f32 %v2768_v22, %v3664_v4  ;;  %v2803_v33 = vadd.f32 %v2795_v24, %v3589_v5  ;;  %v2804_v36 = vadd.f32 %v2796_v25, %v3589_v5  ;;  %2810 = vst.msk [vmem:[%s4261_s14] sm:$0x3] %vm216_vm1, %v2802_v26 }
0x2d4d   :  { %v2809_v35 = vadd.f32 %v2801_v28, %v3589_v5  ;;  %2815 = vst.msk [vmem:[%s4261_s14 + $0xa] sm:$0x3] %vm216_vm1, %v2807_v63  ;;  %2816 = vst.msk [vmem:[%s4261_s14 + $0xc] sm:$0x3] %vm216_vm1, %v2808_v30 }
0x2d4e   :  { %v2805_v4 = vadd.f32 %v2797_v31, %v3589_v5  ;;  %2811 = vst.msk [vmem:[%s4261_s14 + $0x2] sm:$0x3] %vm216_vm1, %v2803_v33  ;;  %2812 = vst.msk [vmem:[%s4261_s14 + $0x4] sm:$0x3] %vm216_vm1, %v2804_v36 }
0x2d4f   :  { %2817 = vst.msk [vmem:[%s4261_s14 + $0xe] sm:$0x3] %vm216_vm1, %v2809_v35 }
0x2d50   :  { %2813 = vst.msk [vmem:[%s4261_s14 + $0x6] sm:$0x3] %vm216_vm1, %v2805_v4 }

</bundles_post_ra>
